<compile_context>
chip_gen: v5e
topology: v5e:2x2
jax: 0.10.0
libtpu: 0.0.40
codegen_flags: <defaults>
</compile_context>

<pallas_src>
import jax
import jax.numpy as jnp
from jax.experimental import pallas as pl
from jax.experimental.pallas import tpu as pltpu

NEG_SLOPE = 0.01          # F.leaky_relu default negative_slope
POOL_K = 90               # MaxPool1d kernel_size (stride=1, padding=0)
VMEM_LIMIT_BYTES = 48 * 1024 * 1024   # < physical VMEM on v5e/v6e/v7x


def _leaky_relu(x):
    return jnp.where(x > 0, x, NEG_SLOPE * x)


def _sliding_window_max(h, k):
    """Sliding max of window `k`, stride 1, along axis -2 of h (..., L, C).

    Log-doubling: O(log2 k) elementwise `jnp.maximum` ops on the VPU instead of
    (L-k+1) cross-sublane reductions on the XLU.
    """
    p = 1
    m = h                                   # window size p, length L - p + 1
    while p * 2 <= k:
        m = jnp.maximum(m[..., :-p, :], m[..., p:, :])
        p *= 2
    off = k - p
    if off > 0:
        out_len = h.shape[-2] - k + 1
        m = jnp.maximum(m[..., :out_len, :], m[..., off:off + out_len, :])
    return m                                # (..., L - k + 1, C)


def cnn_kernel(x_ref, w1_ref, b1_ref, w2_ref, b2_ref, w3_ref, b3_ref, o_ref):
    # x_ref: (Bb, L, Cin) block covering Bb batch elements (Cin == 6, unpadded).
    Bb, L, Cin = x_ref.shape
    Cout = o_ref.shape[-1]

    # Collapse (Bb, L) into one M dimension so every pointwise conv is a single
    # big MXU matmul.  L % 8 == 0 (asserted in the wrapper) keeps this reshape
    # and its inverse free of VMEM relayout copies.
    x = x_ref[...].reshape(Bb * L, Cin).astype(w1_ref.dtype)

    h = _leaky_relu(
        jnp.dot(x, w1_ref[...], preferred_element_type=jnp.float32) + b1_ref[...])
    h = _leaky_relu(
        jnp.dot(h.astype(w2_ref.dtype), w2_ref[...],
                preferred_element_type=jnp.float32) + b2_ref[...])
    h = _leaky_relu(
        jnp.dot(h.astype(w3_ref.dtype), w3_ref[...],
                preferred_element_type=jnp.float32) + b3_ref[...])      # (Bb*L, 128) f32

    h = h.reshape(Bb, L, Cout)
    o_ref[...] = _sliding_window_max(h, POOL_K).astype(o_ref.dtype)     # (Bb, out_len, 128)


def _num_tensorcores():
    """2 for multi-TensorCore chips (v4/v5p/v7x megacore), else 1 (v5e/v6e)."""
    try:
        kind = jax.devices()[0].device_kind.lower()
    except Exception:
        return 1
    return 2 if any(tag in kind for tag in ("v7", "v4", "v5p")) else 1


def _pick_block_b(B, L, target_rows, num_tc):
    """Largest block_b with block_b*L <= target_rows.  On multi-TC chips keep
    grid >= 2 (balanced) so both TensorCores get work; on single-TC chips the
    whole batch may go in one block."""
    block_b = max(1, min(B, target_rows // L))
    if num_tc >= 2 and B >= 2:
        block_b = min(block_b, (B + 1) // 2)    # ceil(B/2) -> grid >= 2, balanced
    return block_b


def cnn_forward(x, params, *, block_b=None, target_rows=8192,
                matmul_dtype=None, flatten=True):
    """x: (B, L, 6)  ->  (B, 128 * (L - 89)), matching CNNNet.forward output.

    flatten=False returns the lane-dense (B, out_len, 128) tile instead (let the
    consumer do / fuse the channel-major transpose and skip one HBM round trip).
    """
    w1, b1, w2, b2, w3, b3 = params
    B, L, Cin = x.shape
    assert Cin == 6 and L >= POOL_K
    # Layout guard: keeps the (Bb*L, C) <-> (Bb, L, C) reshapes in the kernel
    # free (no sublane relayout copies).
    assert L % 8 == 0, "L must be a multiple of 8"
    out_len = L - POOL_K + 1
    Cout = w3.shape[1]                                        # 128

    if block_b is None:
        block_b = _pick_block_b(B, L, target_rows, _num_tensorcores())
    block_b = min(block_b, B)
    grid_b = pl.cdiv(B, block_b)                              # edge block padded/masked

    if matmul_dtype is not None:                              # optional narrow MXU operands
        w1 = w1.astype(matmul_dtype)
        w2 = w2.astype(matmul_dtype)
        w3 = w3.astype(matmul_dtype)

    out = pl.pallas_call(
        cnn_kernel,
        out_shape=jax.ShapeDtypeStruct((B, out_len, Cout), x.dtype),
        grid_spec=pltpu.PrefetchScalarGridSpec(
            num_scalar_prefetch=0,
            grid=(grid_b,),
            in_specs=[
                pl.BlockSpec((block_b, L, Cin), lambda b: (b, 0, 0)),
                pl.BlockSpec(w1.shape, lambda b: (0, 0)),
                pl.BlockSpec(b1.shape, lambda b: (0, 0)),
                pl.BlockSpec(w2.shape, lambda b: (0, 0)),
                pl.BlockSpec(b2.shape, lambda b: (0, 0)),
                pl.BlockSpec(w3.shape, lambda b: (0, 0)),
                pl.BlockSpec(b3.shape, lambda b: (0, 0)),
            ],
            out_specs=pl.BlockSpec((block_b, out_len, Cout), lambda b: (b, 0, 0)),
        ),
        compiler_params=pltpu.CompilerParams(
            dimension_semantics=("parallel",),
            vmem_limit_bytes=VMEM_LIMIT_BYTES),
    )(x, w1, b1, w2, b2, w3, b3)

    if not flatten:
        return out                                            # (B, out_len, 128)

    # PyTorch flattens (B, 128, out_len).view(B, -1) -> channel-major ordering.
    # out_len (e.g. 7) is not a lane multiple, so the kernel keeps a lane-dense
    # store and this tiny transpose stays in the wrapper (fuse downstream via
    # flatten=False if the consumer can take the (B, out_len, 128) layout).
    out_ncl = jnp.transpose(out, (0, 2, 1))                   # (B, 128, out_len)
    return out_ncl.reshape(B, Cout * out_len)


def init_params(key):
    """Deterministic Conv1d-style init (uniform +/- 1/sqrt(fan_in)); weights are
    stored pre-transposed as (Cin, Cout) for the (M, Cin) @ (Cin, Cout) matmul."""
    ks = jax.random.split(key, 6)

    def uni(k, shape, fan_in):
        bound = 1.0 / jnp.sqrt(jnp.float32(fan_in))
        return jax.random.uniform(k, shape, jnp.float32, -bound, bound)

    w1 = uni(ks[0], (6, 32), 6);    b1 = uni(ks[1], (1, 32), 6)
    w2 = uni(ks[2], (32, 64), 32);  b2 = uni(ks[3], (1, 64), 32)
    w3 = uni(ks[4], (64, 128), 64); b3 = uni(ks[5], (1, 128), 64)
    return w1, b1, w2, b2, w3, b3


def reference_forward(x, params):
    """Pure-JAX f32 reference mirroring the PyTorch forward (for validation)."""
    w1, b1, w2, b2, w3, b3 = params
    h = x
    for w, b in ((w1, b1), (w2, b2), (w3, b3)):
        h = _leaky_relu(
            jnp.einsum("blc,cd->bld", h, w, preferred_element_type=jnp.float32) + b)
    B, L, C = h.shape
    out_len = L - POOL_K + 1
    pooled = jnp.stack(
        [jnp.max(h[:, t:t + POOL_K, :], axis=1) for t in range(out_len)], axis=1
    )                                                          # (B, out_len, 128)
    return jnp.transpose(pooled, (0, 2, 1)).reshape(B, C * out_len)


if __name__ == "__main__":
    key = jax.random.PRNGKey(0)
    k_x, k_p = jax.random.split(key)

    B, L = 4, 96                       # L >= 90 required by MaxPool1d(90)
    x = jax.random.normal(k_x, (B, L, 6), dtype=jnp.float32)
    params = init_params(k_p)

    out = jax.jit(cnn_forward)(x, params)
    out = jax.block_until_ready(out)

    assert out.shape == (B, 128 * (L - POOL_K + 1)), out.shape

    ref = reference_forward(x, params)
    max_err = float(jnp.max(jnp.abs(out - ref)))
    assert jnp.allclose(out, ref, atol=2e-2, rtol=2e-2), max_err

    print("KERNEL_OK")
</pallas_src>

<mosaic_0001>
module attributes {stable_mosaic.version = 11 : i64} {
  func.func @cnn_kernel(%arg0: i32, %arg1: memref<4x96x6xf32, #tpu.memory_space<vmem>>, %arg2: memref<6x32xf32, #tpu.memory_space<vmem>>, %arg3: memref<1x32xf32, #tpu.memory_space<vmem>>, %arg4: memref<32x64xf32, #tpu.memory_space<vmem>>, %arg5: memref<1x64xf32, #tpu.memory_space<vmem>>, %arg6: memref<64x128xf32, #tpu.memory_space<vmem>>, %arg7: memref<1x128xf32, #tpu.memory_space<vmem>>, %arg8: memref<4x7x128xf32, #tpu.memory_space<vmem>>) attributes {dimension_semantics = [#tpu.dimension_semantics<parallel>], iteration_bounds = array<i64: 1>, scalar_prefetch = 0 : i64, scratch_operands = 0 : i64, tpu.core_type = #tpu.core_type<tc>, window_params = [{transform_indices = @transform_0, window_bounds = array<i64: 4, 96, 6>}, {pipeline_mode = #tpu.pipeline_mode<synchronous>, transform_indices = @transform_1, window_bounds = array<i64: 6, 32>}, {pipeline_mode = #tpu.pipeline_mode<synchronous>, transform_indices = @transform_2, window_bounds = array<i64: 1, 32>}, {pipeline_mode = #tpu.pipeline_mode<synchronous>, transform_indices = @transform_3, window_bounds = array<i64: 32, 64>}, {pipeline_mode = #tpu.pipeline_mode<synchronous>, transform_indices = @transform_4, window_bounds = array<i64: 1, 64>}, {pipeline_mode = #tpu.pipeline_mode<synchronous>, transform_indices = @transform_5, window_bounds = array<i64: 64, 128>}, {pipeline_mode = #tpu.pipeline_mode<synchronous>, transform_indices = @transform_6, window_bounds = array<i64: 1, 128>}, {transform_indices = @transform_7, window_bounds = array<i64: 4, 7, 128>}]} {
    %c0 = arith.constant 0 : index
    %c0_0 = arith.constant 0 : index
    %c0_1 = arith.constant 0 : index
    %0 = vector.load %arg1[%c0, %c0_0, %c0_1] : memref<4x96x6xf32, #tpu.memory_space<vmem>>, vector<4x96x6xf32>
    %1 = vector.shape_cast %0 : vector<4x96x6xf32> to vector<384x6xf32>
    %c0_2 = arith.constant 0 : index
    %c0_3 = arith.constant 0 : index
    %2 = vector.load %arg2[%c0_2, %c0_3] : memref<6x32xf32, #tpu.memory_space<vmem>>, vector<6x32xf32>
    %cst = arith.constant dense<0.000000e+00> : vector<384x32xf32>
    %3 = tpu.matmul %1, %2, %cst {dimension_numbers = #tpu.dot_dimension_numbers<[1], [0], [0], [1], [0, 0, 1, 1], [], []>} : vector<384x6xf32>, vector<6x32xf32>, vector<384x32xf32> -> vector<384x32xf32>
    %c0_4 = arith.constant 0 : index
    %c0_5 = arith.constant 0 : index
    %4 = vector.load %arg3[%c0_4, %c0_5] : memref<1x32xf32, #tpu.memory_space<vmem>>, vector<1x32xf32>
    %5 = vector.broadcast %4 : vector<1x32xf32> to vector<384x32xf32>
    %6 = arith.addf %3, %5 : vector<384x32xf32>
    %cst_6 = arith.constant 0.000000e+00 : f32
    %7 = vector.broadcast %cst_6 : f32 to vector<384x32xf32>
    %8 = arith.cmpf ogt, %6, %7 : vector<384x32xf32>
    %cst_7 = arith.constant 0.00999999977 : f32
    %9 = vector.broadcast %cst_7 : f32 to vector<384x32xf32>
    %10 = arith.mulf %9, %6 : vector<384x32xf32>
    %11 = arith.select %8, %6, %10 : vector<384x32xi1>, vector<384x32xf32>
    %c0_8 = arith.constant 0 : index
    %c0_9 = arith.constant 0 : index
    %12 = vector.load %arg4[%c0_8, %c0_9] : memref<32x64xf32, #tpu.memory_space<vmem>>, vector<32x64xf32>
    %cst_10 = arith.constant dense<0.000000e+00> : vector<384x64xf32>
    %13 = tpu.matmul %11, %12, %cst_10 {dimension_numbers = #tpu.dot_dimension_numbers<[1], [0], [0], [1], [0, 0, 1, 1], [], []>} : vector<384x32xf32>, vector<32x64xf32>, vector<384x64xf32> -> vector<384x64xf32>
    %c0_11 = arith.constant 0 : index
    %c0_12 = arith.constant 0 : index
    %14 = vector.load %arg5[%c0_11, %c0_12] : memref<1x64xf32, #tpu.memory_space<vmem>>, vector<1x64xf32>
    %15 = vector.broadcast %14 : vector<1x64xf32> to vector<384x64xf32>
    %16 = arith.addf %13, %15 : vector<384x64xf32>
    %cst_13 = arith.constant 0.000000e+00 : f32
    %17 = vector.broadcast %cst_13 : f32 to vector<384x64xf32>
    %18 = arith.cmpf ogt, %16, %17 : vector<384x64xf32>
    %cst_14 = arith.constant 0.00999999977 : f32
    %19 = vector.broadcast %cst_14 : f32 to vector<384x64xf32>
    %20 = arith.mulf %19, %16 : vector<384x64xf32>
    %21 = arith.select %18, %16, %20 : vector<384x64xi1>, vector<384x64xf32>
    %c0_15 = arith.constant 0 : index
    %c0_16 = arith.constant 0 : index
    %22 = vector.load %arg6[%c0_15, %c0_16] : memref<64x128xf32, #tpu.memory_space<vmem>>, vector<64x128xf32>
    %cst_17 = arith.constant dense<0.000000e+00> : vector<384x128xf32>
    %23 = tpu.matmul %21, %22, %cst_17 {dimension_numbers = #tpu.dot_dimension_numbers<[1], [0], [0], [1], [0, 0, 1, 1], [], []>} : vector<384x64xf32>, vector<64x128xf32>, vector<384x128xf32> -> vector<384x128xf32>
    %c0_18 = arith.constant 0 : index
    %c0_19 = arith.constant 0 : index
    %24 = vector.load %arg7[%c0_18, %c0_19] : memref<1x128xf32, #tpu.memory_space<vmem>>, vector<1x128xf32>
    %25 = vector.broadcast %24 : vector<1x128xf32> to vector<384x128xf32>
    %26 = arith.addf %23, %25 : vector<384x128xf32>
    %cst_20 = arith.constant 0.000000e+00 : f32
    %27 = vector.broadcast %cst_20 : f32 to vector<384x128xf32>
    %28 = arith.cmpf ogt, %26, %27 : vector<384x128xf32>
    %cst_21 = arith.constant 0.00999999977 : f32
    %29 = vector.broadcast %cst_21 : f32 to vector<384x128xf32>
    %30 = arith.mulf %29, %26 : vector<384x128xf32>
    %31 = arith.select %28, %26, %30 : vector<384x128xi1>, vector<384x128xf32>
    %32 = vector.shape_cast %31 : vector<384x128xf32> to vector<4x96x128xf32>
    %33 = vector.extract_strided_slice %32 {offsets = [0, 0, 0], sizes = [4, 95, 128], strides = [1, 1, 1]} : vector<4x96x128xf32> to vector<4x95x128xf32>
    %34 = vector.extract_strided_slice %32 {offsets = [0, 1, 0], sizes = [4, 95, 128], strides = [1, 1, 1]} : vector<4x96x128xf32> to vector<4x95x128xf32>
    %35 = arith.maximumf %33, %34 : vector<4x95x128xf32>
    %36 = vector.extract_strided_slice %35 {offsets = [0, 0, 0], sizes = [4, 93, 128], strides = [1, 1, 1]} : vector<4x95x128xf32> to vector<4x93x128xf32>
    %37 = vector.extract_strided_slice %35 {offsets = [0, 2, 0], sizes = [4, 93, 128], strides = [1, 1, 1]} : vector<4x95x128xf32> to vector<4x93x128xf32>
    %38 = arith.maximumf %36, %37 : vector<4x93x128xf32>
    %39 = vector.extract_strided_slice %38 {offsets = [0, 0, 0], sizes = [4, 89, 128], strides = [1, 1, 1]} : vector<4x93x128xf32> to vector<4x89x128xf32>
    %40 = vector.extract_strided_slice %38 {offsets = [0, 4, 0], sizes = [4, 89, 128], strides = [1, 1, 1]} : vector<4x93x128xf32> to vector<4x89x128xf32>
    %41 = arith.maximumf %39, %40 : vector<4x89x128xf32>
    %42 = vector.extract_strided_slice %41 {offsets = [0, 0, 0], sizes = [4, 81, 128], strides = [1, 1, 1]} : vector<4x89x128xf32> to vector<4x81x128xf32>
    %43 = vector.extract_strided_slice %41 {offsets = [0, 8, 0], sizes = [4, 81, 128], strides = [1, 1, 1]} : vector<4x89x128xf32> to vector<4x81x128xf32>
    %44 = arith.maximumf %42, %43 : vector<4x81x128xf32>
    %45 = vector.extract_strided_slice %44 {offsets = [0, 0, 0], sizes = [4, 65, 128], strides = [1, 1, 1]} : vector<4x81x128xf32> to vector<4x65x128xf32>
    %46 = vector.extract_strided_slice %44 {offsets = [0, 16, 0], sizes = [4, 65, 128], strides = [1, 1, 1]} : vector<4x81x128xf32> to vector<4x65x128xf32>
    %47 = arith.maximumf %45, %46 : vector<4x65x128xf32>
    %48 = vector.extract_strided_slice %47 {offsets = [0, 0, 0], sizes = [4, 33, 128], strides = [1, 1, 1]} : vector<4x65x128xf32> to vector<4x33x128xf32>
    %49 = vector.extract_strided_slice %47 {offsets = [0, 32, 0], sizes = [4, 33, 128], strides = [1, 1, 1]} : vector<4x65x128xf32> to vector<4x33x128xf32>
    %50 = arith.maximumf %48, %49 : vector<4x33x128xf32>
    %51 = vector.extract_strided_slice %50 {offsets = [0, 0, 0], sizes = [4, 7, 128], strides = [1, 1, 1]} : vector<4x33x128xf32> to vector<4x7x128xf32>
    %52 = vector.extract_strided_slice %50 {offsets = [0, 26, 0], sizes = [4, 7, 128], strides = [1, 1, 1]} : vector<4x33x128xf32> to vector<4x7x128xf32>
    %53 = arith.maximumf %51, %52 : vector<4x7x128xf32>
    %c0_22 = arith.constant 0 : index
    %c0_23 = arith.constant 0 : index
    %c0_24 = arith.constant 0 : index
    %54 = vector.load %arg8[%c0_22, %c0_23, %c0_24] : memref<4x7x128xf32, #tpu.memory_space<vmem>>, vector<4x7x128xf32>
    tpu.vector_store %arg8[%c0_22, %c0_23, %c0_24], %53 {strides = array<i32>} : memref<4x7x128xf32, #tpu.memory_space<vmem>>, vector<4x7x128xf32>,
    return
  }
  func.func @transform_0(%arg0: i32) -> (i32, i32, i32) {
    %c0_i32 = arith.constant 0 : i32
    %c0_i32_0 = arith.constant 0 : i32
    %c0_i32_1 = arith.constant 0 : i32
    return %arg0, %c0_i32, %c0_i32_0 : i32, i32, i32
  }
  func.func @transform_1(%arg0: i32) -> (i32, i32) {
    %c0_i32 = arith.constant 0 : i32
    %c0_i32_0 = arith.constant 0 : i32
    %c0_i32_1 = arith.constant 0 : i32
    return %c0_i32, %c0_i32_0 : i32, i32
  }
  func.func @transform_2(%arg0: i32) -> (i32, i32) {
    %c0_i32 = arith.constant 0 : i32
    %c0_i32_0 = arith.constant 0 : i32
    %c0_i32_1 = arith.constant 0 : i32
    return %c0_i32, %c0_i32_0 : i32, i32
  }
  func.func @transform_3(%arg0: i32) -> (i32, i32) {
    %c0_i32 = arith.constant 0 : i32
    %c0_i32_0 = arith.constant 0 : i32
    %c0_i32_1 = arith.constant 0 : i32
    return %c0_i32, %c0_i32_0 : i32, i32
  }
  func.func @transform_4(%arg0: i32) -> (i32, i32) {
    %c0_i32 = arith.constant 0 : i32
    %c0_i32_0 = arith.constant 0 : i32
    %c0_i32_1 = arith.constant 0 : i32
    return %c0_i32, %c0_i32_0 : i32, i32
  }
  func.func @transform_5(%arg0: i32) -> (i32, i32) {
    %c0_i32 = arith.constant 0 : i32
    %c0_i32_0 = arith.constant 0 : i32
    %c0_i32_1 = arith.constant 0 : i32
    return %c0_i32, %c0_i32_0 : i32, i32
  }
  func.func @transform_6(%arg0: i32) -> (i32, i32) {
    %c0_i32 = arith.constant 0 : i32
    %c0_i32_0 = arith.constant 0 : i32
    %c0_i32_1 = arith.constant 0 : i32
    return %c0_i32, %c0_i32_0 : i32, i32
  }
  func.func @transform_7(%arg0: i32) -> (i32, i32, i32) {
    %c0_i32 = arith.constant 0 : i32
    %c0_i32_0 = arith.constant 0 : i32
    %c0_i32_1 = arith.constant 0 : i32
    return %arg0, %c0_i32, %c0_i32_0 : i32, i32, i32
  }
}

</mosaic_0001>

<bundles_post_ra>
// kernel: cnn_forward.1
= control target key start
LH: loop header
LB: loop body
LE: loop exit
PB: predicated region body
PF: predicated region fallthrough
CT: control target
= control target key end

     0   :  { %vm224_vm0 = vcmask 1045504   ;;  %vm79_vm1 = vcmask 48128   ;;  %vm541_vm3 = vcmask 261120   ;;  %s3288_s1 = inlined_call_operand.vmem [shape: f32[6,32], index: 1, kind: input, shape index: {}]   ;;  %s3289_s0 = inlined_call_operand.vmem [shape: f32[4,96,6], index: 0, kind: input, shape index: {}]   ;;  %s3290_s2 = inlined_call_operand.vmem [shape: f32[1,32], index: 2, kind: input, shape index: {}]   ;;  %s3291_s3 = inlined_call_operand.vmem [shape: f32[32,64], index: 3, kind: input, shape index: {}]   ;;  %s3292_s4 = inlined_call_operand.vmem [shape: f32[1,64], index: 4, kind: input, shape index: {}]   ;;  %s3293_s5 = inlined_call_operand.vmem [shape: f32[64,128], index: 5, kind: input, shape index: {}]   ;;  %s3294_s6 = inlined_call_operand.vmem [shape: f32[1,128], index: 6, kind: input, shape index: {}]   ;;  %s3295_s7 = inlined_call_operand.vmem [shape: f32[4,7,128], index: 7, kind: output, shape index: {}]  }
   0x1   :  { %v74_v0 = vld [vmem:[%s3288_s1] sm:$0x3f]  ;;  %v27_v2 = vld [vmem:[%s3289_s0 + $0x8] sm:$0xff]  ;;  %v28_v3 = vld [vmem:[%s3289_s0 + $0x10] sm:$0xff] }
   0x2   :  { %v26_v1 = vld [vmem:[%s3289_s0] sm:$0xff]  ;;  %2271 = vmatpush.msk.msra.mxu0 %vm224_vm0, %v74_v0  ;;  %2416 = vmatpush.msk.msra.mxu3 %vm224_vm0, %v74_v0  ;;  %v29_v4 = vld [vmem:[%s3289_s0 + $0x18] sm:$0xff]  ;;  %v31_v6 = vld [vmem:[%s3289_s0 + $0x28] sm:$0xff] }
   0x3   :  { %2272 = vmatmul.msk.f32.vlgmr.msra.gmra.mxu0 %vm79_vm1, %v26_v1  ;;  %v30_v5 = vld [vmem:[%s3289_s0 + $0x20] sm:$0xff]  ;;  %v32_v7 = vld [vmem:[%s3289_s0 + $0x30] sm:$0xff]  ;;  %v33_v8 = vld [vmem:[%s3289_s0 + $0x38] sm:$0xff] }
   0x4   :  { %v34_v9 = vld [vmem:[%s3289_s0 + $0x40] sm:$0xff]  ;;  %v35_v10 = vld [vmem:[%s3289_s0 + $0x48] sm:$0xff]  ;;  %v36_v11 = vld [vmem:[%s3289_s0 + $0x50] sm:$0xff] }
   0x5   :  { %v37_v12 = vld [vmem:[%s3289_s0 + $0x58] sm:$0xff]  ;;  %v38_v14 = vld [vmem:[%s3289_s0 + $0x60] sm:$0xff]  ;;  %v535_v15 = vld [vmem:[%s3291_s3 + $0x10] sm:$0xff] }
   0x6   :  { %v536_v13 = vld [vmem:[%s3291_s3 + $0x18] sm:$0xff]  ;;  %v534_v16 = vld [vmem:[%s3291_s3 + $0x8] sm:$0xff]  ;;  %v533_v17 = vld [vmem:[%s3291_s3] sm:$0xff] }
   0x7   :  { %698 = vmatpush.msra.mxu1 %v536_v13  ;;  %2417 = vmatpush.msrb.mxu3 %v536_v13  ;;  %v39_v18 = vld [vmem:[%s3289_s0 + $0x68] sm:$0xff]  ;;  %v40_v19 = vld [vmem:[%s3289_s0 + $0x70] sm:$0xff]  ;;  %v41_v20 = vld [vmem:[%s3289_s0 + $0x78] sm:$0xff] }
   0x8   :  { %v2559_v21 = vld [vmem:[%s3290_s2] ss:$0 sm:$0xff]  ;;  %v43_v28 = vld [vmem:[%s3289_s0 + $0x88] sm:$0xff]  ;;  %v44_v33 = vld [vmem:[%s3289_s0 + $0x90] sm:$0xff] }
   0x9   :  { %699 = vmatpush.msra.mxu1 %v535_v15  ;;  %2418 = vmatpush.msrb.mxu3 %v535_v15  ;;  %v42_v23 = vld [vmem:[%s3289_s0 + $0x80] sm:$0xff]  ;;  %v45_v38 = vld [vmem:[%s3289_s0 + $0x98] sm:$0xff]  ;;  %v47_v48 = vld [vmem:[%s3289_s0 + $0xa8] sm:$0xff] }
   0xa   :  { %v46_v43 = vld [vmem:[%s3289_s0 + $0xa0] sm:$0xff]  ;;  %v48_v53 = vld [vmem:[%s3289_s0 + $0xb0] sm:$0xff]  ;;  %v49_v58 = vld [vmem:[%s3289_s0 + $0xb8] sm:$0xff] }
   0xb   :  { %2273 = vmatmul.msk.f32.gmra.mxu0 %vm79_vm1, %v27_v2  ;;  %700 = vmatpush.msra.mxu1 %v534_v16  ;;  %v50_v63 = vld [vmem:[%s3289_s0 + $0xc0] sm:$0xff] }
   0xc   :  { %2419 = vmatpush.msrb.mxu3 %v534_v16  ;;  %v2634_v16 = vld [vmem:[%s3293_s5 + $0x38] sm:$0xff] }
   0xd   :  { %701 = vmatpush.msra.mxu1 %v533_v17  ;;  %1156 = vmatpush.msra.mxu2 %v2634_v16 }
   0xe   :  { %2420 = vmatpush.msrb.mxu3 %v533_v17 }
  0x13   :  { %2274 = vmatmul.msk.f32.gmra.mxu0 %vm79_vm1, %v28_v3 }
  0x1b   :  { %2275 = vmatmul.msk.f32.gmra.mxu0 %vm79_vm1, %v29_v4  ;;  %v51_v4 = vld [vmem:[%s3289_s0 + $0xc8] sm:$0xff] }
  0x23   :  { %2276 = vmatmul.msk.f32.gmra.mxu0 %vm79_vm1, %v30_v5 }
  0x2b   :  { %2277 = vmatmul.msk.f32.gmra.mxu0 %vm79_vm1, %v31_v6 }
  0x33   :  { %2278 = vmatmul.msk.f32.gmra.mxu0 %vm79_vm1, %v32_v7 }
  0x3b   :  { %2279 = vmatmul.msk.f32.gmra.mxu0 %vm79_vm1, %v33_v8 }
  0x43   :  { %2280 = vmatmul.msk.f32.gmra.mxu0 %vm79_vm1, %v34_v9  ;;  %v52_v9 = vld [vmem:[%s3289_s0 + $0xd0] sm:$0xff] }
  0x4b   :  { %2281 = vmatmul.msk.f32.gmra.mxu0 %vm79_vm1, %v35_v10 }
  0x53   :  { %2282 = vmatmul.msk.f32.gmra.mxu0 %vm79_vm1, %v36_v11 }
  0x5b   :  { %2283 = vmatmul.msk.f32.gmra.mxu0 %vm79_vm1, %v37_v12 }
  0x63   :  { %2284 = vmatmul.msk.f32.gmra.mxu0 %vm79_vm1, %v38_v14  ;;  %v53_v14 = vld [vmem:[%s3289_s0 + $0xd8] sm:$0xff] }
  0x6b   :  { %2285 = vmatmul.msk.f32.gmra.mxu0 %vm79_vm1, %v39_v18  ;;  %v2641_v18 = vld [vmem:[%s3293_s5 + $0x30] sm:$0xff] }
  0x6c   :  { %1157 = vmatpush.msra.mxu2 %v2641_v18 }
  0x73   :  { %2286 = vmatmul.msk.f32.gmra.mxu0 %vm79_vm1, %v40_v19 }
  0x7b   :  { %2287 = vmatmul.msk.f32.gmra.mxu0 %vm79_vm1, %v41_v20  ;;  %v2647_v20 = vld [vmem:[%s3293_s5 + $0x28] sm:$0xff] }
  0x7c   :  { %1158 = vmatpush.msra.mxu2 %v2647_v20 }
  0x80   :  { %v245_v22 = vpop.f32.mrf.mxu0 }
  0x81   :  { %v246_v24 = vadd.f32 %v2559_v21, %v245_v22  ;;  %v2654_v22 = vld [vmem:[%s3293_s5 + $0x20] sm:$0xff] }
  0x82   :  { %1159 = vmatpush.msra.mxu2 %v2654_v22 }
  0x83   :  { %2288 = vmatmul.msk.f32.gmra.mxu0 %vm79_vm1, %v42_v23  ;;  %vm389_vm2 = vcmp.gt.f32.partialorder %v246_v24, 0.0  ;;  %v437_v25 = vmul.f32 0.01, %v246_v24 }
  0x85   :  { %v485_v26 = vsel %vm389_vm2, %v246_v24, %v437_v25  ;;  %v54_v24 = vld [vmem:[%s3289_s0 + $0xe0] sm:$0xff] }
  0x86   :  { %2320 = vmatmul.msk.f32.vlgmr.msra.gmra.mxu1 %vm541_vm3, %v485_v26  ;;  %v2664_v26 = vld [vmem:[%s3293_s5 + $0x18] sm:$0xff] }
  0x87   :  { %1160 = vmatpush.msra.mxu2 %v2664_v26 }
  0x88   :  { %v248_v27 = vpop.f32.mrf.mxu0 }
  0x89   :  { %v249_v29 = vadd.f32 %v2559_v21, %v248_v27 }
  0x8b   :  { %2289 = vmatmul.msk.f32.gmra.mxu0 %vm79_vm1, %v43_v28  ;;  %vm390_vm4 = vcmp.gt.f32.partialorder %v249_v29, 0.0  ;;  %v438_v30 = vmul.f32 0.01, %v249_v29  ;;  %v2671_v28 = vld [vmem:[%s3293_s5 + $0x10] sm:$0xff] }
  0x8c   :  { %1161 = vmatpush.msra.mxu2 %v2671_v28 }
  0x8d   :  { %v486_v31 = vsel %vm390_vm4, %v249_v29, %v438_v30  ;;  %v2677_v30 = vld [vmem:[%s3293_s5 + $0x8] sm:$0xff] }
  0x8e   :  { %2321 = vmatmul.msk.f32.gmra.mxu1 %vm541_vm3, %v486_v31  ;;  %1162 = vmatpush.msra.mxu2 %v2677_v30  ;;  %v2684_v31 = vld [vmem:[%s3293_s5] sm:$0xff] }
  0x90   :  { %v251_v32 = vpop.f32.mrf.mxu0  ;;  %1163 = vmatpush.msra.mxu2 %v2684_v31 }
  0x91   :  { %v252_v34 = vadd.f32 %v2559_v21, %v251_v32 }
  0x93   :  { %2290 = vmatmul.msk.f32.gmra.mxu0 %vm79_vm1, %v44_v33  ;;  %vm391_vm5 = vcmp.gt.f32.partialorder %v252_v34, 0.0  ;;  %v439_v35 = vmul.f32 0.01, %v252_v34  ;;  %v55_v33 = vld [vmem:[%s3289_s0 + $0xe8] sm:$0xff] }
  0x95   :  { %v487_v36 = vsel %vm391_vm5, %v252_v34, %v439_v35 }
  0x96   :  { %2322 = vmatmul.msk.f32.gmra.mxu1 %vm541_vm3, %v487_v36 }
  0x98   :  { %v254_v37 = vpop.f32.mrf.mxu0 }
  0x99   :  { %v255_v39 = vadd.f32 %v2559_v21, %v254_v37 }
  0x9b   :  { %2291 = vmatmul.msk.f32.gmra.mxu0 %vm79_vm1, %v45_v38  ;;  %vm392_vm6 = vcmp.gt.f32.partialorder %v255_v39, 0.0  ;;  %v440_v40 = vmul.f32 0.01, %v255_v39  ;;  %v56_v38 = vld [vmem:[%s3289_s0 + $0xf0] sm:$0xff] }
  0x9d   :  { %v488_v41 = vsel %vm392_vm6, %v255_v39, %v440_v40 }
  0x9e   :  { %2323 = vmatmul.msk.f32.gmra.mxu1 %vm541_vm3, %v488_v41 }
  0xa0   :  { %v257_v42 = vpop.f32.mrf.mxu0 }
  0xa1   :  { %v258_v44 = vadd.f32 %v2559_v21, %v257_v42 }
  0xa3   :  { %2292 = vmatmul.msk.f32.gmra.mxu0 %vm79_vm1, %v46_v43  ;;  %vm393_vm7 = vcmp.gt.f32.partialorder %v258_v44, 0.0  ;;  %v441_v45 = vmul.f32 0.01, %v258_v44  ;;  %v57_v43 = vld [vmem:[%s3289_s0 + $0xf8] sm:$0xff] }
  0xa5   :  { %v489_v46 = vsel %vm393_vm7, %v258_v44, %v441_v45 }
  0xa6   :  { %2324 = vmatmul.msk.f32.gmra.mxu1 %vm541_vm3, %v489_v46 }
  0xa8   :  { %v260_v47 = vpop.f32.mrf.mxu0 }
  0xa9   :  { %v261_v49 = vadd.f32 %v2559_v21, %v260_v47 }
  0xab   :  { %2293 = vmatmul.msk.f32.gmra.mxu0 %vm79_vm1, %v47_v48  ;;  %vm394_vm8 = vcmp.gt.f32.partialorder %v261_v49, 0.0  ;;  %v442_v50 = vmul.f32 0.01, %v261_v49  ;;  %v58_v48 = vld [vmem:[%s3289_s0 + $0x100] sm:$0xff] }
  0xad   :  { %v490_v51 = vsel %vm394_vm8, %v261_v49, %v442_v50  ;;  %v2711_v49 = vld [vmem:[%s3292_s4] ss:$0 sm:$0xff]  ;;  %vm1003_vm8 = vcmask 523264  }
  0xae   :  { %2325 = vmatmul.msk.f32.gmra.mxu1 %vm541_vm3, %v490_v51  ;;  %v63_v51 = vld [vmem:[%s3289_s0 + $0x128] sm:$0xff] }
  0xaf   :  { %2309 = vmatmul.msk.f32.vlgmr.msra.gmra.mxu3 %vm79_vm1, %v63_v51 }
  0xb0   :  { %v263_v52 = vpop.f32.mrf.mxu0  ;;  %2421 = vmatpush.msra.mxu3 %v2634_v16 }
  0xb1   :  { %v264_v54 = vadd.f32 %v2559_v21, %v263_v52 }
  0xb2   :  { %2422 = vmatpush.msra.mxu3 %v2641_v18 }
  0xb3   :  { %2294 = vmatmul.msk.f32.gmra.mxu0 %vm79_vm1, %v48_v53  ;;  %vm395_vm9 = vcmp.gt.f32.partialorder %v264_v54, 0.0  ;;  %v443_v55 = vmul.f32 0.01, %v264_v54 }
  0xb4   :  { %2423 = vmatpush.msra.mxu3 %v2647_v20 }
  0xb5   :  { %v491_v56 = vsel %vm395_vm9, %v264_v54, %v443_v55 }
  0xb6   :  { %2326 = vmatmul.msk.f32.gmra.mxu1 %vm541_vm3, %v491_v56  ;;  %2424 = vmatpush.msra.mxu3 %v2654_v22 }
  0xb8   :  { %v266_v57 = vpop.f32.mrf.mxu0  ;;  %2425 = vmatpush.msra.mxu3 %v2664_v26  ;;  %v62_v26 = vld [vmem:[%s3289_s0 + $0x120] sm:$0xff] }
  0xb9   :  { %v267_v59 = vadd.f32 %v2559_v21, %v266_v57 }
  0xba   :  { %2426 = vmatpush.msra.mxu3 %v2671_v28  ;;  %v67_v28 = vld [vmem:[%s3289_s0 + $0x148] sm:$0xff] }
  0xbb   :  { %2295 = vmatmul.msk.f32.gmra.mxu0 %vm79_vm1, %v49_v58  ;;  %vm396_vm10 = vcmp.gt.f32.partialorder %v267_v59, 0.0  ;;  %v444_v60 = vmul.f32 0.01, %v267_v59 }
  0xbc   :  { %2427 = vmatpush.msra.mxu3 %v2677_v30 }
  0xbd   :  { %v492_v61 = vsel %vm396_vm10, %v267_v59, %v444_v60  ;;  %v59_v59 = vld [vmem:[%s3289_s0 + $0x108] sm:$0xff] }
  0xbe   :  { %2327 = vmatmul.msk.f32.gmra.mxu1 %vm541_vm3, %v492_v61  ;;  %v64_v61 = vld [vmem:[%s3289_s0 + $0x130] sm:$0xff]  ;;  %2428 = vmatpush.msra.mxu3 %v2684_v31 }
  0xbf   :  { %2310 = vmatmul.msk.f32.gmra.mxu3 %vm79_vm1, %v64_v61 }
  0xc0   :  { %v269_v62 = vpop.f32.mrf.mxu0 }
  0xc1   :  { %v270_v0 = vadd.f32 %v2559_v21, %v269_v62 }
  0xc3   :  { %2296 = vmatmul.msk.f32.gmra.mxu0 %vm79_vm1, %v50_v63  ;;  %vm397_vm11 = vcmp.gt.f32.partialorder %v270_v0, 0.0  ;;  %v445_v1 = vmul.f32 0.01, %v270_v0 }
  0xc5   :  { %v493_v2 = vsel %vm397_vm11, %v270_v0, %v445_v1 }
  0xc6   :  { %2328 = vmatmul.msk.f32.gmra.mxu1 %vm541_vm3, %v493_v2 }
  0xc8   :  { %v272_v3 = vpop.f32.mrf.mxu0 }
  0xc9   :  { %v273_v5 = vadd.f32 %v2559_v21, %v272_v3 }
  0xcb   :  { %2297 = vmatmul.msk.f32.gmra.mxu0 %vm79_vm1, %v51_v4  ;;  %vm398_vm12 = vcmp.gt.f32.partialorder %v273_v5, 0.0  ;;  %v446_v6 = vmul.f32 0.01, %v273_v5 }
  0xcd   :  { %v494_v7 = vsel %vm398_vm12, %v273_v5, %v446_v6  ;;  %v60_v5 = vld [vmem:[%s3289_s0 + $0x110] sm:$0xff] }
  0xce   :  { %2329 = vmatmul.msk.f32.gmra.mxu1 %vm541_vm3, %v494_v7  ;;  %v65_v7 = vld [vmem:[%s3289_s0 + $0x138] sm:$0xff] }
  0xcf   :  { %2311 = vmatmul.msk.f32.gmra.mxu3 %vm79_vm1, %v65_v7 }
  0xd0   :  { %v275_v8 = vpop.f32.mrf.mxu0 }
  0xd1   :  { %v276_v10 = vadd.f32 %v2559_v21, %v275_v8 }
  0xd3   :  { %2298 = vmatmul.msk.f32.gmra.mxu0 %vm79_vm1, %v52_v9  ;;  %vm399_vm13 = vcmp.gt.f32.partialorder %v276_v10, 0.0  ;;  %v447_v11 = vmul.f32 0.01, %v276_v10 }
  0xd5   :  { %v495_v12 = vsel %vm399_vm13, %v276_v10, %v447_v11 }
  0xd6   :  { %2330 = vmatmul.msk.f32.gmra.mxu1 %vm541_vm3, %v495_v12 }
  0xd8   :  { %v278_v13 = vpop.f32.mrf.mxu0 }
  0xd9   :  { %v279_v15 = vadd.f32 %v2559_v21, %v278_v13 }
  0xdb   :  { %2299 = vmatmul.msk.f32.gmra.mxu0 %vm79_vm1, %v53_v14  ;;  %vm400_vm14 = vcmp.gt.f32.partialorder %v279_v15, 0.0  ;;  %v448_v17 = vmul.f32 0.01, %v279_v15 }
  0xdd   :  { %v496_v19 = vsel %vm400_vm14, %v279_v15, %v448_v17  ;;  %v61_v15 = vld [vmem:[%s3289_s0 + $0x118] sm:$0xff]  ;;  %v66_v17 = vld [vmem:[%s3289_s0 + $0x140] sm:$0xff] }
  0xde   :  { %2331 = vmatmul.msk.f32.gmra.mxu1 %vm541_vm3, %v496_v19  ;;  %2312 = vmatmul.msk.f32.gmra.mxu3 %vm79_vm1, %v66_v17 }
  0xe0   :  { %v281_v23 = vpop.f32.mrf.mxu0 }
  0xe1   :  { %v282_v25 = vadd.f32 %v2559_v21, %v281_v23 }
  0xe3   :  { %2300 = vmatmul.msk.f32.gmra.mxu0 %vm79_vm1, %v54_v24  ;;  %vm401_vm15 = vcmp.gt.f32.partialorder %v282_v25, 0.0  ;;  %v449_v27 = vmul.f32 0.01, %v282_v25 }
  0xe5   :  { %v497_v29 = vsel %vm401_vm15, %v282_v25, %v449_v27 }
  0xe6   :  { %2332 = vmatmul.msk.f32.gmra.mxu1 %vm541_vm3, %v497_v29  ;;  %2313 = vmatmul.msk.f32.gmra.mxu3 %vm79_vm1, %v67_v28 }
  0xe8   :  { %v284_v32 = vpop.f32.mrf.mxu0 }
  0xe9   :  { %v285_v34 = vadd.f32 %v2559_v21, %v284_v32 }
  0xeb   :  { %v450_v35 = vmul.f32 0.01, %v285_v34  ;;  %2301 = vmatmul.msk.f32.gmra.mxu0 %vm79_vm1, %v55_v33  ;;  %vm402_vm2 = vcmp.gt.f32.partialorder %v285_v34, 0.0 }
  0xed   :  { %v498_v36 = vsel %vm402_vm2, %v285_v34, %v450_v35 }
  0xee   :  { %2333 = vmatmul.msk.f32.gmra.mxu1 %vm541_vm3, %v498_v36 }
  0xf0   :  { %v287_v37 = vpop.f32.mrf.mxu0 }
  0xf1   :  { %v288_v39 = vadd.f32 %v2559_v21, %v287_v37  ;;  %v68_v37 = vld [vmem:[%s3289_s0 + $0x150] sm:$0xff] }
  0xf2   :  { %2314 = vmatmul.msk.f32.gmra.mxu3 %vm79_vm1, %v68_v37 }
  0xf3   :  { %v451_v40 = vmul.f32 0.01, %v288_v39  ;;  %2302 = vmatmul.msk.f32.gmra.mxu0 %vm79_vm1, %v56_v38  ;;  %vm403_vm4 = vcmp.gt.f32.partialorder %v288_v39, 0.0 }
  0xf5   :  { %v499_v41 = vsel %vm403_vm4, %v288_v39, %v451_v40 }
  0xf6   :  { %2334 = vmatmul.msk.f32.gmra.mxu1 %vm541_vm3, %v499_v41 }
  0xf8   :  { %v290_v42 = vpop.f32.mrf.mxu0 }
  0xf9   :  { %v291_v44 = vadd.f32 %v2559_v21, %v290_v42 }
  0xfb   :  { %v452_v45 = vmul.f32 0.01, %v291_v44  ;;  %2303 = vmatmul.msk.f32.gmra.mxu0 %vm79_vm1, %v57_v43  ;;  %vm404_vm5 = vcmp.gt.f32.partialorder %v291_v44, 0.0 }
  0xfd   :  { %v500_v46 = vsel %vm404_vm5, %v291_v44, %v452_v45 }
  0xfe   :  { %2335 = vmatmul.msk.f32.gmra.mxu1 %vm541_vm3, %v500_v46  ;;  %v69_v46 = vld [vmem:[%s3289_s0 + $0x158] sm:$0xff] }
  0xff   :  { %2315 = vmatmul.msk.f32.gmra.mxu3 %vm79_vm1, %v69_v46 }
 0x100   :  { %v293_v47 = vpop.f32.mrf.mxu0 }
 0x101   :  { %v294_v50 = vadd.f32 %v2559_v21, %v293_v47 }
 0x103   :  { %v453_v52 = vmul.f32 0.01, %v294_v50  ;;  %2304 = vmatmul.msk.f32.gmra.mxu0 %vm79_vm1, %v58_v48  ;;  %v703_v53 = vpop.f32.mrf.mxu1  ;;  %vm405_vm6 = vcmp.gt.f32.partialorder %v294_v50, 0.0 }
 0x104   :  { %v704_v54 = vadd.f32 %v2711_v49, %v703_v53 }
 0x105   :  { %v501_v55 = vsel %vm405_vm6, %v294_v50, %v453_v52 }
 0x106   :  { %2336 = vmatmul.msk.f32.gmra.mxu1 %vm541_vm3, %v501_v55  ;;  %vm847_vm7 = vcmp.gt.f32.partialorder %v704_v54, 0.0  ;;  %v895_v56 = vmul.f32 0.01, %v704_v54 }
 0x108   :  { %v296_v57 = vpop.f32.mrf.mxu0  ;;  %v943_v58 = vsel %vm847_vm7, %v704_v54, %v895_v56  ;;  %v70_v56 = vld [vmem:[%s3289_s0 + $0x160] sm:$0xff] }
 0x109   :  { %v297_v60 = vadd.f32 %v2559_v21, %v296_v57  ;;  %2368 = vmatmul.msk.f32.vlgmr.msra.gmra.mxu2 %vm1003_vm8, %v943_v58  ;;  %2316 = vmatmul.msk.f32.gmra.mxu3 %vm79_vm1, %v70_v56 }
 0x10b   :  { %v454_v62 = vmul.f32 0.01, %v297_v60  ;;  %2305 = vmatmul.msk.f32.gmra.mxu0 %vm79_vm1, %v59_v59  ;;  %v706_v63 = vpop.f32.mrf.mxu1  ;;  %vm406_vm9 = vcmp.gt.f32.partialorder %v297_v60, 0.0 }
 0x10c   :  { %v707_v0 = vadd.f32 %v2711_v49, %v706_v63 }
 0x10d   :  { %v502_v1 = vsel %vm406_vm9, %v297_v60, %v454_v62 }
 0x10e   :  { %2337 = vmatmul.msk.f32.gmra.mxu1 %vm541_vm3, %v502_v1  ;;  %vm848_vm10 = vcmp.gt.f32.partialorder %v707_v0, 0.0  ;;  %v896_v2 = vmul.f32 0.01, %v707_v0  ;;  %v71_v1 = vld [vmem:[%s3289_s0 + $0x168] sm:$0xff] }
 0x110   :  { %v299_v3 = vpop.f32.mrf.mxu0  ;;  %v944_v4 = vsel %vm848_vm10, %v707_v0, %v896_v2 }
 0x111   :  { %v300_v6 = vadd.f32 %v2559_v21, %v299_v3  ;;  %2369 = vmatmul.msk.f32.gmra.mxu2 %vm1003_vm8, %v944_v4  ;;  %2317 = vmatmul.msk.f32.gmra.mxu3 %vm79_vm1, %v71_v1 }
 0x113   :  { %v455_v8 = vmul.f32 0.01, %v300_v6  ;;  %2306 = vmatmul.msk.f32.gmra.mxu0 %vm79_vm1, %v60_v5  ;;  %v709_v9 = vpop.f32.mrf.mxu1  ;;  %vm407_vm11 = vcmp.gt.f32.partialorder %v300_v6, 0.0 }
 0x114   :  { %v710_v10 = vadd.f32 %v2711_v49, %v709_v9 }
 0x115   :  { %v503_v11 = vsel %vm407_vm11, %v300_v6, %v455_v8 }
 0x116   :  { %2338 = vmatmul.msk.f32.gmra.mxu1 %vm541_vm3, %v503_v11  ;;  %vm849_vm12 = vcmp.gt.f32.partialorder %v710_v10, 0.0  ;;  %v897_v12 = vmul.f32 0.01, %v710_v10 }
 0x118   :  { %v302_v13 = vpop.f32.mrf.mxu0  ;;  %v945_v14 = vsel %vm849_vm12, %v710_v10, %v897_v12  ;;  %v72_v10 = vld [vmem:[%s3289_s0 + $0x170] sm:$0xff] }
 0x119   :  { %v303_v16 = vadd.f32 %v2559_v21, %v302_v13  ;;  %2370 = vmatmul.msk.f32.gmra.mxu2 %vm1003_vm8, %v945_v14  ;;  %2318 = vmatmul.msk.f32.gmra.mxu3 %vm79_vm1, %v72_v10 }
 0x11b   :  { %v456_v18 = vmul.f32 0.01, %v303_v16  ;;  %2307 = vmatmul.msk.f32.gmra.mxu0 %vm79_vm1, %v61_v15  ;;  %v712_v19 = vpop.f32.mrf.mxu1  ;;  %vm408_vm13 = vcmp.gt.f32.partialorder %v303_v16, 0.0 }
 0x11c   :  { %v713_v20 = vadd.f32 %v2711_v49, %v712_v19  ;;  %v73_v19 = vld [vmem:[%s3289_s0 + $0x178] sm:$0xff] }
 0x11d   :  { %v504_v22 = vsel %vm408_vm13, %v303_v16, %v456_v18 }
 0x11e   :  { %2339 = vmatmul.msk.f32.gmra.mxu1 %vm541_vm3, %v504_v22  ;;  %vm850_vm14 = vcmp.gt.f32.partialorder %v713_v20, 0.0  ;;  %v898_v23 = vmul.f32 0.01, %v713_v20 }
 0x120   :  { %v305_v24 = vpop.f32.mrf.mxu0  ;;  %v946_v25 = vsel %vm850_vm14, %v713_v20, %v898_v23 }
 0x121   :  { %v306_v27 = vadd.f32 %v2559_v21, %v305_v24  ;;  %2371 = vmatmul.msk.f32.gmra.mxu2 %vm1003_vm8, %v946_v25  ;;  %2319 = vmatmul.msk.f32.gmra.mxu3 %vm79_vm1, %v73_v19 }
 0x123   :  { %v457_v29 = vmul.f32 0.01, %v306_v27  ;;  %2308 = vmatmul.msk.f32.gmra.mxu0 %vm79_vm1, %v62_v26  ;;  %v715_v30 = vpop.f32.mrf.mxu1  ;;  %vm409_vm15 = vcmp.gt.f32.partialorder %v306_v27, 0.0 }
 0x124   :  { %v716_v31 = vadd.f32 %v2711_v49, %v715_v30 }
 0x125   :  { %v505_v32 = vsel %vm409_vm15, %v306_v27, %v457_v29 }
 0x126   :  { %2340 = vmatmul.msk.f32.gmra.mxu1 %vm541_vm3, %v505_v32  ;;  %vm851_vm2 = vcmp.gt.f32.partialorder %v716_v31, 0.0  ;;  %v899_v33 = vmul.f32 0.01, %v716_v31 }
 0x128   :  { %v308_v34 = vpop.f32.mrf.mxu0  ;;  %v947_v35 = vsel %vm851_vm2, %v716_v31, %v899_v33 }
 0x129   :  { %v309_v36 = vadd.f32 %v2559_v21, %v308_v34  ;;  %2372 = vmatmul.msk.f32.gmra.mxu2 %vm1003_vm8, %v947_v35 }
 0x12b   :  { %v458_v38 = vmul.f32 0.01, %v309_v36  ;;  %v718_v39 = vpop.f32.mrf.mxu1  ;;  %vm410_vm4 = vcmp.gt.f32.partialorder %v309_v36, 0.0 }
 0x12c   :  { %v719_v40 = vadd.f32 %v2711_v49, %v718_v39 }
 0x12d   :  { %v506_v41 = vsel %vm410_vm4, %v309_v36, %v458_v38 }
 0x12e   :  { %2341 = vmatmul.msk.f32.gmra.mxu1 %vm541_vm3, %v506_v41  ;;  %vm852_vm5 = vcmp.gt.f32.partialorder %v719_v40, 0.0  ;;  %v900_v42 = vmul.f32 0.01, %v719_v40 }
 0x130   :  { %v311_v43 = vpop.f32.mrf.mxu0  ;;  %v948_v44 = vsel %vm852_vm5, %v719_v40, %v900_v42 }
 0x131   :  { %v312_v45 = vadd.f32 %v2559_v21, %v311_v43  ;;  %2373 = vmatmul.msk.f32.gmra.mxu2 %vm1003_vm8, %v948_v44 }
 0x133   :  { %v459_v47 = vmul.f32 0.01, %v312_v45  ;;  %v721_v48 = vpop.f32.mrf.mxu1  ;;  %vm411_vm6 = vcmp.gt.f32.partialorder %v312_v45, 0.0 }
 0x134   :  { %v722_v50 = vadd.f32 %v2711_v49, %v721_v48 }
 0x135   :  { %v507_v51 = vsel %vm411_vm6, %v312_v45, %v459_v47 }
 0x136   :  { %2342 = vmatmul.msk.f32.gmra.mxu1 %vm541_vm3, %v507_v51  ;;  %vm853_vm7 = vcmp.gt.f32.partialorder %v722_v50, 0.0  ;;  %v901_v52 = vmul.f32 0.01, %v722_v50 }
 0x138   :  { %v314_v53 = vpop.f32.mrf.mxu0  ;;  %v949_v54 = vsel %vm853_vm7, %v722_v50, %v901_v52 }
 0x139   :  { %v315_v55 = vadd.f32 %v2559_v21, %v314_v53  ;;  %2374 = vmatmul.msk.f32.gmra.mxu2 %vm1003_vm8, %v949_v54 }
 0x13b   :  { %v460_v57 = vmul.f32 0.01, %v315_v55  ;;  %v724_v58 = vpop.f32.mrf.mxu1  ;;  %vm412_vm9 = vcmp.gt.f32.partialorder %v315_v55, 0.0 }
 0x13c   :  { %v725_v59 = vadd.f32 %v2711_v49, %v724_v58 }
 0x13d   :  { %v508_v60 = vsel %vm412_vm9, %v315_v55, %v460_v57 }
 0x13e   :  { %2343 = vmatmul.msk.f32.gmra.mxu1 %vm541_vm3, %v508_v60  ;;  %vm854_vm10 = vcmp.gt.f32.partialorder %v725_v59, 0.0  ;;  %v902_v61 = vmul.f32 0.01, %v725_v59 }
 0x140   :  { %v317_v62 = vpop.f32.mrf.mxu0  ;;  %v950_v63 = vsel %vm854_vm10, %v725_v59, %v902_v61 }
 0x141   :  { %v318_v0 = vadd.f32 %v2559_v21, %v317_v62  ;;  %2375 = vmatmul.msk.f32.gmra.mxu2 %vm1003_vm8, %v950_v63 }
 0x143   :  { %vm413_vm11 = vcmp.gt.f32.partialorder %v318_v0, 0.0  ;;  %v461_v2 = vmul.f32 0.01, %v318_v0  ;;  %v727_v3 = vpop.f32.mrf.mxu1 }
 0x144   :  { %v728_v4 = vadd.f32 %v2711_v49, %v727_v3 }
 0x145   :  { %v509_v5 = vsel %vm413_vm11, %v318_v0, %v461_v2 }
 0x146   :  { %2344 = vmatmul.msk.f32.gmra.mxu1 %vm541_vm3, %v509_v5  ;;  %vm855_vm12 = vcmp.gt.f32.partialorder %v728_v4, 0.0  ;;  %v903_v6 = vmul.f32 0.01, %v728_v4 }
 0x148   :  { %v320_v7 = vpop.f32.mrf.mxu0  ;;  %v951_v8 = vsel %vm855_vm12, %v728_v4, %v903_v6 }
 0x149   :  { %v321_v9 = vadd.f32 %v2559_v21, %v320_v7  ;;  %2376 = vmatmul.msk.f32.gmra.mxu2 %vm1003_vm8, %v951_v8 }
 0x14b   :  { %vm414_vm13 = vcmp.gt.f32.partialorder %v321_v9, 0.0  ;;  %v462_v11 = vmul.f32 0.01, %v321_v9  ;;  %v730_v12 = vpop.f32.mrf.mxu1 }
 0x14c   :  { %v731_v13 = vadd.f32 %v2711_v49, %v730_v12 }
 0x14d   :  { %v510_v14 = vsel %vm414_vm13, %v321_v9, %v462_v11 }
 0x14e   :  { %2345 = vmatmul.msk.f32.gmra.mxu1 %vm541_vm3, %v510_v14  ;;  %vm856_vm14 = vcmp.gt.f32.partialorder %v731_v13, 0.0  ;;  %v904_v15 = vmul.f32 0.01, %v731_v13 }
 0x150   :  { %v323_v16 = vpop.f32.mrf.mxu0  ;;  %v952_v17 = vsel %vm856_vm14, %v731_v13, %v904_v15  ;;  %v2849_v13 = vpop.f32.mrf.mxu3 }
 0x151   :  { %v324_v18 = vadd.f32 %v2559_v21, %v323_v16  ;;  %2377 = vmatmul.msk.f32.gmra.mxu2 %vm1003_vm8, %v952_v17  ;;  %v2856_v17 = vld [vmem:[%s3294_s6] ss:$0 sm:$0xff] }
 0x153   :  { %vm415_vm15 = vcmp.gt.f32.partialorder %v324_v18, 0.0  ;;  %v463_v20 = vmul.f32 0.01, %v324_v18  ;;  %v733_v22 = vpop.f32.mrf.mxu1 }
 0x154   :  { %v734_v23 = vadd.f32 %v2711_v49, %v733_v22 }
 0x155   :  { %v511_v24 = vsel %vm415_vm15, %v324_v18, %v463_v20 }
 0x156   :  { %2346 = vmatmul.msk.f32.gmra.mxu1 %vm541_vm3, %v511_v24  ;;  %vm857_vm2 = vcmp.gt.f32.partialorder %v734_v23, 0.0  ;;  %v905_v25 = vmul.f32 0.01, %v734_v23 }
 0x158   :  { %v326_v26 = vpop.f32.mrf.mxu0  ;;  %v953_v27 = vsel %vm857_vm2, %v734_v23, %v905_v25 }
 0x159   :  { %v327_v28 = vadd.f32 %v2559_v21, %v326_v26  ;;  %2378 = vmatmul.msk.f32.gmra.mxu2 %vm1003_vm8, %v953_v27  ;;  %v2863_v27 = vpop.f32.mrf.mxu3 }
 0x15b   :  { %vm416_vm4 = vcmp.gt.f32.partialorder %v327_v28, 0.0  ;;  %v464_v29 = vmul.f32 0.01, %v327_v28  ;;  %v736_v30 = vpop.f32.mrf.mxu1 }
 0x15c   :  { %v737_v31 = vadd.f32 %v2711_v49, %v736_v30 }
 0x15d   :  { %v512_v32 = vsel %vm416_vm4, %v327_v28, %v464_v29 }
 0x15e   :  { %2347 = vmatmul.msk.f32.gmra.mxu1 %vm541_vm3, %v512_v32  ;;  %vm858_vm1 = vcmp.gt.f32.partialorder %v737_v31, 0.0  ;;  %v906_v33 = vmul.f32 0.01, %v737_v31 }
 0x160   :  { %v329_v34 = vpop.f32.mrf.mxu0  ;;  %v954_v35 = vsel %vm858_vm1, %v737_v31, %v906_v33 }
 0x161   :  { %v330_v36 = vadd.f32 %v2559_v21, %v329_v34  ;;  %2379 = vmatmul.msk.f32.gmra.mxu2 %vm1003_vm8, %v954_v35 }
 0x163   :  { %vm417_vm5 = vcmp.gt.f32.partialorder %v330_v36, 0.0  ;;  %v465_v37 = vmul.f32 0.01, %v330_v36  ;;  %v739_v38 = vpop.f32.mrf.mxu1 }
 0x164   :  { %v740_v39 = vadd.f32 %v2711_v49, %v739_v38 }
 0x165   :  { %v513_v40 = vsel %vm417_vm5, %v330_v36, %v465_v37 }
 0x166   :  { %v907_v41 = vmul.f32 0.01, %v740_v39  ;;  %2348 = vmatmul.msk.f32.gmra.mxu1 %vm541_vm3, %v513_v40  ;;  %vm859_vm6 = vcmp.gt.f32.partialorder %v740_v39, 0.0 }
 0x168   :  { %v332_v42 = vpop.f32.mrf.mxu0  ;;  %v955_v43 = vsel %vm859_vm6, %v740_v39, %v907_v41 }
 0x169   :  { %v333_v44 = vadd.f32 %v2559_v21, %v332_v42  ;;  %2380 = vmatmul.msk.f32.gmra.mxu2 %vm1003_vm8, %v955_v43 }
 0x16b   :  { %vm418_vm7 = vcmp.gt.f32.partialorder %v333_v44, 0.0  ;;  %v466_v45 = vmul.f32 0.01, %v333_v44  ;;  %v742_v46 = vpop.f32.mrf.mxu1 }
 0x16c   :  { %v743_v47 = vadd.f32 %v2711_v49, %v742_v46 }
 0x16d   :  { %v514_v48 = vsel %vm418_vm7, %v333_v44, %v466_v45 }
 0x16e   :  { %v908_v50 = vmul.f32 0.01, %v743_v47  ;;  %2349 = vmatmul.msk.f32.gmra.mxu1 %vm541_vm3, %v514_v48  ;;  %vm860_vm9 = vcmp.gt.f32.partialorder %v743_v47, 0.0 }
 0x170   :  { %v335_v51 = vpop.f32.mrf.mxu0  ;;  %v956_v52 = vsel %vm860_vm9, %v743_v47, %v908_v50  ;;  %vm1501_vm9 = vcmask 1046528   ;;  %v2872_v50 = vpop.f32.mrf.mxu3 }
 0x171   :  { %v336_v53 = vadd.f32 %v2559_v21, %v335_v51  ;;  %2381 = vmatmul.msk.f32.gmra.mxu2 %vm1003_vm8, %v956_v52 }
 0x173   :  { %vm419_vm10 = vcmp.gt.f32.partialorder %v336_v53, 0.0  ;;  %v467_v54 = vmul.f32 0.01, %v336_v53  ;;  %v745_v55 = vpop.f32.mrf.mxu1 }
 0x174   :  { %v746_v56 = vadd.f32 %v2711_v49, %v745_v55 }
 0x175   :  { %v515_v57 = vsel %vm419_vm10, %v336_v53, %v467_v54 }
 0x176   :  { %v909_v58 = vmul.f32 0.01, %v746_v56  ;;  %2350 = vmatmul.msk.f32.gmra.mxu1 %vm541_vm3, %v515_v57  ;;  %vm861_vm11 = vcmp.gt.f32.partialorder %v746_v56, 0.0 }
 0x178   :  { %v338_v59 = vpop.f32.mrf.mxu0  ;;  %v957_v60 = vsel %vm861_vm11, %v746_v56, %v909_v58 }
 0x179   :  { %v339_v61 = vadd.f32 %v2559_v21, %v338_v59  ;;  %2382 = vmatmul.msk.f32.gmra.mxu2 %vm1003_vm8, %v957_v60 }
 0x17b   :  { %vm420_vm12 = vcmp.gt.f32.partialorder %v339_v61, 0.0  ;;  %v468_v62 = vmul.f32 0.01, %v339_v61  ;;  %v748_v63 = vpop.f32.mrf.mxu1 }
 0x17c   :  { %v749_v0 = vadd.f32 %v2711_v49, %v748_v63 }
 0x17d   :  { %v516_v1 = vsel %vm420_vm12, %v339_v61, %v468_v62 }
 0x17e   :  { %v910_v2 = vmul.f32 0.01, %v749_v0  ;;  %2351 = vmatmul.msk.f32.gmra.mxu1 %vm541_vm3, %v516_v1  ;;  %vm862_vm13 = vcmp.gt.f32.partialorder %v749_v0, 0.0 }
 0x180   :  { %v341_v3 = vpop.f32.mrf.mxu0  ;;  %v958_v4 = vsel %vm862_vm13, %v749_v0, %v910_v2 }
 0x181   :  { %v342_v5 = vadd.f32 %v2559_v21, %v341_v3  ;;  %2383 = vmatmul.msk.f32.gmra.mxu2 %vm1003_vm8, %v958_v4  ;;  %v357_v4 = vadd.f32 %v2559_v21, %v2849_v13 }
 0x183   :  { %vm421_vm14 = vcmp.gt.f32.partialorder %v342_v5, 0.0  ;;  %v469_v6 = vmul.f32 0.01, %v342_v5  ;;  %v751_v7 = vpop.f32.mrf.mxu1 }
 0x184   :  { %v752_v8 = vadd.f32 %v2711_v49, %v751_v7  ;;  %v2884_v7 = vpop.f32.mrf.mxu3 }
 0x185   :  { %v517_v9 = vsel %vm421_vm14, %v342_v5, %v469_v6 }
 0x186   :  { %v911_v10 = vmul.f32 0.01, %v752_v8  ;;  %2352 = vmatmul.msk.f32.gmra.mxu1 %vm541_vm3, %v517_v9  ;;  %vm863_vm15 = vcmp.gt.f32.partialorder %v752_v8, 0.0 }
 0x188   :  { %v344_v11 = vpop.f32.mrf.mxu0  ;;  %v959_v12 = vsel %vm863_vm15, %v752_v8, %v911_v10 }
 0x189   :  { %v345_v14 = vadd.f32 %v2559_v21, %v344_v11  ;;  %2384 = vmatmul.msk.f32.gmra.mxu2 %vm1003_vm8, %v959_v12 }
 0x18b   :  { %vm422_vm2 = vcmp.gt.f32.partialorder %v345_v14, 0.0  ;;  %v470_v15 = vmul.f32 0.01, %v345_v14  ;;  %v754_v16 = vpop.f32.mrf.mxu1 }
 0x18c   :  { %v755_v18 = vadd.f32 %v2711_v49, %v754_v16  ;;  %v1165_v19 = vpop.f32.mrf.mxu2 }
 0x18d   :  { %v518_v20 = vsel %vm422_vm2, %v345_v14, %v470_v15  ;;  %v1166_v23 = vadd.f32 %v2856_v17, %v1165_v19  ;;  %v474_v15 = vmul.f32 0.01, %v357_v4  ;;  %vm426_vm2 = vcmp.gt.f32.partialorder %v357_v4, 0.0 }
 0x18e   :  { %v912_v22 = vmul.f32 0.01, %v755_v18  ;;  %2353 = vmatmul.msk.f32.gmra.mxu1 %vm541_vm3, %v518_v20  ;;  %vm864_vm4 = vcmp.gt.f32.partialorder %v755_v18, 0.0 }
 0x18f   :  { %v1357_v28 = vmul.f32 0.01, %v1166_v23  ;;  %vm1309_vm5 = vcmp.gt.f32.partialorder %v1166_v23, 0.0 }
 0x190   :  { %v347_v24 = vpop.f32.mrf.mxu0  ;;  %v960_v25 = vsel %vm864_vm4, %v755_v18, %v912_v22 }
 0x191   :  { %v348_v26 = vadd.f32 %v2559_v21, %v347_v24  ;;  %2385 = vmatmul.msk.f32.gmra.mxu2 %vm1003_vm8, %v960_v25  ;;  %v1405_v36 = vsel %vm1309_vm5, %v1166_v23, %v1357_v28  ;;  %v360_v25 = vadd.f32 %v2559_v21, %v2863_v27 }
 0x192   :  { %v1502_v42 = vrot.slane %v1405_v36, 1 }
 0x193   :  { %vm423_vm1 = vcmp.gt.f32.partialorder %v348_v26, 0.0  ;;  %v471_v29 = vmul.f32 0.01, %v348_v26  ;;  %v757_v30 = vpop.f32.mrf.mxu1  ;;  %vm427_vm5 = vcmp.gt.f32.partialorder %v360_v25, 0.0 }
 0x194   :  { %v758_v31 = vadd.f32 %v2711_v49, %v757_v30  ;;  %v1168_v32 = vpop.f32.mrf.mxu2 }
 0x195   :  { %v1169_v33 = vadd.f32 %v2856_v17, %v1168_v32  ;;  %v519_v34 = vsel %vm423_vm1, %v348_v26, %v471_v29  ;;  %v522_v26 = vsel %vm426_vm2, %v357_v4, %v474_v15  ;;  %v2896_v32 = vpop.f32.mrf.mxu3 }
 0x196   :  { %v913_v35 = vmul.f32 0.01, %v758_v31  ;;  %2354 = vmatmul.msk.f32.gmra.mxu1 %vm541_vm3, %v519_v34  ;;  %vm865_vm6 = vcmp.gt.f32.partialorder %v758_v31, 0.0 }
 0x197   :  { %vm1310_vm7 = vcmp.gt.f32.partialorder %v1169_v33, 0.0  ;;  %v1358_v37 = vmul.f32 0.01, %v1169_v33 }
 0x198   :  { %v350_v38 = vpop.f32.mrf.mxu0  ;;  %v961_v39 = vsel %vm865_vm6, %v758_v31, %v913_v35  ;;  %v475_v35 = vmul.f32 0.01, %v360_v25  ;;  %vm1974_vm6 = vcmask 1043456  }
 0x199   :  { %v1406_v40 = vsel %vm1310_vm7, %v1169_v33, %v1358_v37  ;;  %v351_v41 = vadd.f32 %v2559_v21, %v350_v38  ;;  %2386 = vmatmul.msk.f32.gmra.mxu2 %vm1003_vm8, %v961_v39 }
 0x19a   :  { %v1503_v43 = vrot.slane %v1406_v40, 1 }
 0x19b   :  { %vm424_vm10 = vcmp.gt.f32.partialorder %v351_v41, 0.0  ;;  %v472_v44 = vmul.f32 0.01, %v351_v41  ;;  %v760_v45 = vpop.f32.mrf.mxu1 }
 0x19c   :  { %v1504_v46 = vsel %vm1501_vm9, %v1502_v42, %v1503_v43  ;;  %v761_v47 = vadd.f32 %v2711_v49, %v760_v45  ;;  %v1171_v48 = vpop.f32.mrf.mxu2 }
 0x19d   :  { %v1642_v51 = vmax.f32 %v1405_v36, %v1504_v46  ;;  %v1172_v52 = vadd.f32 %v2856_v17, %v1171_v48  ;;  %v520_v53 = vsel %vm424_vm10, %v351_v41, %v472_v44  ;;  %v2907_v44 = vld [vmem:[%s3290_s2] ss:$0 sm:$0xff]  ;;  %v523_v46 = vsel %vm427_vm5, %v360_v25, %v475_v35 }
 0x19e   :  { %v914_v54 = vmul.f32 0.01, %v761_v47  ;;  %2355 = vmatmul.msk.f32.gmra.mxu1 %vm541_vm3, %v520_v53  ;;  %vm866_vm11 = vcmp.gt.f32.partialorder %v761_v47, 0.0  ;;  %v363_v45 = vadd.f32 %v2907_v44, %v2872_v50 }
 0x19f   :  { %vm1311_vm12 = vcmp.gt.f32.partialorder %v1172_v52, 0.0  ;;  %v1359_v55 = vmul.f32 0.01, %v1172_v52  ;;  %v1738_v8 = vrot.slane %v1642_v51, 2 }
 0x1a0   :  { %v353_v56 = vpop.f32.mrf.mxu0  ;;  %v962_v57 = vsel %vm866_vm11, %v761_v47, %v914_v54  ;;  %vm428_vm11 = vcmp.gt.f32.partialorder %v363_v45, 0.0 }
 0x1a1   :  { %v1407_v58 = vsel %vm1311_vm12, %v1172_v52, %v1359_v55  ;;  %v354_v59 = vadd.f32 %v2559_v21, %v353_v56  ;;  %2387 = vmatmul.msk.f32.gmra.mxu2 %vm1003_vm8, %v962_v57  ;;  %v476_v57 = vmul.f32 0.01, %v363_v45 }
 0x1a2   :  { %v1505_v60 = vrot.slane %v1407_v58, 1 }
 0x1a3   :  { %vm425_vm13 = vcmp.gt.f32.partialorder %v354_v59, 0.0  ;;  %v473_v61 = vmul.f32 0.01, %v354_v59  ;;  %v763_v62 = vpop.f32.mrf.mxu1  ;;  %v524_v4 = vsel %vm428_vm11, %v363_v45, %v476_v57 }
 0x1a4   :  { %v1506_v63 = vsel %vm1501_vm9, %v1503_v43, %v1505_v60  ;;  %v764_v0 = vadd.f32 %v2711_v49, %v763_v62  ;;  %v1174_v1 = vpop.f32.mrf.mxu2 }
 0x1a5   :  { %v1643_v2 = vmax.f32 %v1406_v40, %v1506_v63  ;;  %v1175_v3 = vadd.f32 %v2856_v17, %v1174_v1  ;;  %v521_v5 = vsel %vm425_vm13, %v354_v59, %v473_v61  ;;  %v371_v59 = vpop.f32.mrf.mxu3 }
 0x1a6   :  { %v915_v6 = vmul.f32 0.01, %v764_v0  ;;  %2356 = vmatmul.msk.f32.vlgmr.msrb.gmra.mxu3 %vm541_vm3, %v521_v5  ;;  %vm867_vm14 = vcmp.gt.f32.partialorder %v764_v0, 0.0 }
 0x1a7   :  { %v1739_v9 = vrot.slane %v1643_v2, 2  ;;  %vm1312_vm15 = vcmp.gt.f32.partialorder %v1175_v3, 0.0  ;;  %v1360_v10 = vmul.f32 0.01, %v1175_v3 }
 0x1a8   :  { %v963_v11 = vsel %vm867_vm14, %v764_v0, %v915_v6 }
 0x1a9   :  { %v1740_v12 = vsel %vm224_vm0, %v1738_v8, %v1739_v9  ;;  %v1408_v14 = vsel %vm1312_vm15, %v1175_v3, %v1360_v10  ;;  %2388 = vmatmul.msk.f32.gmra.mxu2 %vm1003_vm8, %v963_v11  ;;  %v366_v3 = vadd.f32 %v2907_v44, %v2884_v7 }
 0x1aa   :  { %v2888_v16 = vmax.f32 %v1642_v51, %v1740_v12  ;;  %v1507_v13 = vrot.slane %v1408_v14, 1 }
 0x1ab   :  { %v766_v18 = vpop.f32.mrf.mxu1  ;;  %v477_v15 = vmul.f32 0.01, %v366_v3  ;;  %vm429_vm14 = vcmp.gt.f32.partialorder %v366_v3, 0.0 }
 0x1ac   :  { %v1508_v19 = vsel %vm1501_vm9, %v1505_v60, %v1507_v13  ;;  %v767_v20 = vadd.f32 %v2711_v49, %v766_v18  ;;  %v1177_v22 = vpop.f32.mrf.mxu2  ;;  %v1975_v27 = vrot.slane %v2888_v16, 4 }
 0x1ad   :  { %v1644_v23 = vmax.f32 %v1407_v58, %v1508_v19  ;;  %v1178_v24 = vadd.f32 %v2856_v17, %v1177_v22 }
 0x1ae   :  { %v916_v28 = vmul.f32 0.01, %v767_v20  ;;  %2357 = vmatmul.msk.f32.gmra.mxu3 %vm541_vm3, %v522_v26  ;;  %vm868_vm4 = vcmp.gt.f32.partialorder %v767_v20, 0.0  ;;  %v369_v26 = vadd.f32 %v2907_v44, %v2896_v32 }
 0x1af   :  { %v1741_v29 = vrot.slane %v1644_v23, 2  ;;  %vm1313_vm1 = vcmp.gt.f32.partialorder %v1178_v24, 0.0  ;;  %v1361_v30 = vmul.f32 0.01, %v1178_v24 }
 0x1b0   :  { %v964_v31 = vsel %vm868_vm4, %v767_v20, %v916_v28  ;;  %v525_v28 = vsel %vm429_vm14, %v366_v3, %v477_v15  ;;  %v478_v32 = vmul.f32 0.01, %v369_v26  ;;  %vm430_vm2 = vcmp.gt.f32.partialorder %v369_v26, 0.0 }
 0x1b1   :  { %v1742_v33 = vsel %vm224_vm0, %v1739_v9, %v1741_v29  ;;  %v1409_v34 = vsel %vm1313_vm1, %v1178_v24, %v1361_v30  ;;  %2389 = vmatmul.msk.f32.gmra.mxu2 %vm1003_vm8, %v964_v31  ;;  %v374_v24 = vpop.f32.mrf.mxu3 }
 0x1b2   :  { %v1879_v36 = vmax.f32 %v1643_v2, %v1742_v33  ;;  %v1509_v37 = vrot.slane %v1409_v34, 1 }
 0x1b3   :  { %v769_v21 = vpop.f32.mrf.mxu1 }
 0x1b4   :  { %v1976_v38 = vrot.slane %v1879_v36, 4  ;;  %v1510_v39 = vsel %vm1501_vm9, %v1507_v13, %v1509_v37  ;;  %v770_v40 = vadd.f32 %v2711_v49, %v769_v21  ;;  %v1180_v41 = vpop.f32.mrf.mxu2 }
 0x1b5   :  { %v1645_v42 = vmax.f32 %v1408_v14, %v1510_v39  ;;  %v1181_v43 = vadd.f32 %v2856_v17, %v1180_v41 }
 0x1b6   :  { %v1977_v47 = vsel %vm1974_vm6, %v1975_v27, %v1976_v38  ;;  %v917_v48 = vmul.f32 0.01, %v770_v40  ;;  %2358 = vmatmul.msk.f32.gmra.mxu3 %vm541_vm3, %v523_v46  ;;  %vm869_vm7 = vcmp.gt.f32.partialorder %v770_v40, 0.0 }
 0x1b7   :  { %v1743_v51 = vrot.slane %v1645_v42, 2  ;;  %vm1314_vm10 = vcmp.gt.f32.partialorder %v1181_v43, 0.0  ;;  %v1362_v52 = vmul.f32 0.01, %v1181_v43  ;;  %v2115_v54 = vmax.f32 %v2888_v16, %v1977_v47 }
 0x1b8   :  { %v965_v53 = vsel %vm869_vm7, %v770_v40, %v917_v48 }
 0x1b9   :  { %v1744_v55 = vsel %vm224_vm0, %v1741_v29, %v1743_v51  ;;  %v1410_v56 = vsel %vm1314_vm10, %v1181_v43, %v1362_v52  ;;  %2390 = vmatmul.msk.f32.gmra.mxu2 %vm1003_vm8, %v965_v53  ;;  %v526_v43 = vsel %vm430_vm2, %v369_v26, %v478_v32  ;;  %v377_v48 = vpop.f32.mrf.mxu3 }
 0x1ba   :  { %v2916_v50 = vmax.f32 %v1644_v23, %v1744_v55  ;;  %v1511_v58 = vrot.slane %v1410_v56, 1 }
 0x1bb   :  { %v772_v60 = vpop.f32.mrf.mxu1 }
 0x1bc   :  { %v1978_v61 = vrot.slane %v2916_v50, 4  ;;  %v1512_v62 = vsel %vm1501_vm9, %v1509_v37, %v1511_v58  ;;  %v773_v63 = vadd.f32 %v2711_v49, %v772_v60  ;;  %v1183_v0 = vpop.f32.mrf.mxu2 }
 0x1bd   :  { %v1646_v1 = vmax.f32 %v1409_v34, %v1512_v62  ;;  %v1184_v2 = vadd.f32 %v2856_v17, %v1183_v0  ;;  %v375_v0 = vadd.f32 %v2907_v44, %v374_v24 }
 0x1be   :  { %v1979_v5 = vsel %vm1974_vm6, %v1976_v38, %v1978_v61  ;;  %v918_v6 = vmul.f32 0.01, %v773_v63  ;;  %2359 = vmatmul.msk.f32.gmra.mxu3 %vm541_vm3, %v524_v4  ;;  %vm870_vm12 = vcmp.gt.f32.partialorder %v773_v63, 0.0 }
 0x1bf   :  { %v1745_v8 = vrot.slane %v1646_v1, 2  ;;  %vm1315_vm13 = vcmp.gt.f32.partialorder %v1184_v2, 0.0  ;;  %v1363_v9 = vmul.f32 0.01, %v1184_v2  ;;  %v2116_v11 = vmax.f32 %v1879_v36, %v1979_v5 }
 0x1c0   :  { %v966_v10 = vsel %vm870_vm12, %v773_v63, %v918_v6  ;;  %vm432_vm12 = vcmp.gt.f32.partialorder %v375_v0, 0.0 }
 0x1c1   :  { %v1746_v12 = vsel %vm224_vm0, %v1743_v51, %v1745_v8  ;;  %v2927_v14 = vsel %vm1315_vm13, %v1184_v2, %v1363_v9  ;;  %2391 = vmatmul.msk.f32.gmra.mxu2 %vm1003_vm8, %v966_v10  ;;  %v2931_v13 = vmax.f32 %v2115_v54, %v2116_v11  ;;  %v480_v10 = vmul.f32 0.01, %v375_v0 }
 0x1c2   :  { %v1881_v7 = vmax.f32 %v1645_v42, %v1746_v12  ;;  %v1513_v16 = vrot.slane %v2927_v14, 1  ;;  %v372_v42 = vadd.f32 %v2907_v44, %v371_v59 }
 0x1c3   :  { %v775_v18 = vpop.f32.mrf.mxu1 }
 0x1c4   :  { %v1980_v19 = vrot.slane %v1881_v7, 4  ;;  %v1514_v20 = vsel %vm1501_vm9, %v1511_v58, %v1513_v16  ;;  %v776_v22 = vadd.f32 %v2711_v49, %v775_v18  ;;  %v1186_v23 = vpop.f32.mrf.mxu2  ;;  %vm431_vm7 = vcmp.gt.f32.partialorder %v372_v42, 0.0 }
 0x1c5   :  { %v2935_v25 = vmax.f32 %v1410_v56, %v1514_v20  ;;  %v1187_v31 = vadd.f32 %v2856_v17, %v1186_v23  ;;  %v479_v56 = vmul.f32 0.01, %v372_v42  ;;  %v378_v20 = vadd.f32 %v2907_v44, %v377_v48 }
 0x1c6   :  { %v1981_v29 = vsel %vm1974_vm6, %v1978_v61, %v1980_v19  ;;  %vm871_vm15 = vcmp.gt.f32.partialorder %v776_v22, 0.0  ;;  %v919_v30 = vmul.f32 0.01, %v776_v22  ;;  %2360 = vmatmul.msk.f32.gmra.mxu3 %vm541_vm3, %v525_v28  ;;  %v528_v23 = vsel %vm432_vm12, %v375_v0, %v480_v10 }
 0x1c7   :  { %v1747_v33 = vrot.slane %v2935_v25, 2  ;;  %v2117_v34 = vmax.f32 %v2916_v50, %v1981_v29  ;;  %v1364_v21 = vmul.f32 0.01, %v1187_v31  ;;  %vm1316_vm4 = vcmp.gt.f32.partialorder %v1187_v31, 0.0 }
 0x1c8   :  { %v967_v35 = vsel %vm871_vm15, %v776_v22, %v919_v30  ;;  %vm433_vm15 = vcmp.gt.f32.partialorder %v378_v20, 0.0 }
 0x1c9   :  { %v1748_v36 = vsel %vm224_vm0, %v1745_v8, %v1747_v33  ;;  %2392 = vmatmul.msk.f32.gmra.mxu2 %vm1003_vm8, %v967_v35  ;;  %v1412_v46 = vsel %vm1316_vm4, %v1187_v31, %v1364_v21  ;;  %v380_v8 = vpop.f32.mrf.mxu3  ;;  %v481_v31 = vmul.f32 0.01, %v378_v20 }
 0x1ca   :  { %v2948_v37 = vmax.f32 %v1646_v1, %v1748_v36  ;;  %v1515_v54 = vrot.slane %v1412_v46, 1  ;;  %v527_v1 = vsel %vm431_vm7, %v372_v42, %v479_v56  ;;  %v381_v21 = vadd.f32 %v2907_v44, %v380_v8 }
 0x1cb   :  { %v778_v27 = vpop.f32.mrf.mxu1 }
 0x1cc   :  { %v1982_v38 = vrot.slane %v2948_v37, 4  ;;  %v779_v39 = vadd.f32 %v2711_v49, %v778_v27  ;;  %v1189_v40 = vpop.f32.mrf.mxu2  ;;  %v1516_v62 = vsel %vm1501_vm9, %v1513_v16, %v1515_v54 }
 0x1cd   :  { %v1190_v41 = vadd.f32 %v2856_v17, %v1189_v40  ;;  %v1648_v5 = vmax.f32 %v2927_v14, %v1516_v62 }
 0x1ce   :  { %v1983_v45 = vsel %vm1974_vm6, %v1980_v19, %v1982_v38  ;;  %vm872_vm1 = vcmp.gt.f32.partialorder %v779_v39, 0.0  ;;  %v920_v47 = vmul.f32 0.01, %v779_v39  ;;  %2361 = vmatmul.msk.f32.gmra.mxu3 %vm541_vm3, %v526_v43 }
 0x1cf   :  { %vm1317_vm5 = vcmp.gt.f32.partialorder %v1190_v41, 0.0  ;;  %v1365_v51 = vmul.f32 0.01, %v1190_v41  ;;  %v2958_v52 = vmax.f32 %v1881_v7, %v1983_v45  ;;  %v1749_v7 = vrot.slane %v1648_v5, 2 }
 0x1d0   :  { %v968_v53 = vsel %vm872_vm1, %v779_v39, %v920_v47  ;;  %v529_v45 = vsel %vm433_vm15, %v378_v20, %v481_v31  ;;  %vm434_vm1 = vcmp.gt.f32.partialorder %v381_v21, 0.0 }
 0x1d1   :  { %v1413_v55 = vsel %vm1317_vm5, %v1190_v41, %v1365_v51  ;;  %2393 = vmatmul.msk.f32.gmra.mxu2 %vm1003_vm8, %v968_v53  ;;  %v2962_v57 = vmax.f32 %v2117_v34, %v2958_v52  ;;  %v1750_v30 = vsel %vm224_vm0, %v1747_v33, %v1749_v7  ;;  %v383_v27 = vpop.f32.mrf.mxu3  ;;  %v2991_v33 = vld [vmem:[%s3292_s4] ss:$0 sm:$0xff] }
 0x1d2   :  { %v1517_v50 = vrot.slane %v1413_v55, 1  ;;  %v1883_v39 = vmax.f32 %v2935_v25, %v1750_v30  ;;  %v384_v25 = vadd.f32 %v2907_v44, %v383_v27 }
 0x1d3   :  { %v781_v58 = vpop.f32.mrf.mxu1  ;;  %v2203_v59 = vmax.f32 %v2931_v13, %v2962_v57 }
 0x1d4   :  { %v782_v60 = vadd.f32 %v2711_v49, %v781_v58  ;;  %v1192_v61 = vpop.f32.mrf.mxu2  ;;  %v1518_v3 = vsel %vm1501_vm9, %v1515_v54, %v1517_v50  ;;  %v482_v54 = vmul.f32 0.01, %v381_v21  ;;  %vm435_vm7 = vcmp.gt.f32.partialorder %v384_v25, 0.0 }
 0x1d5   :  { %v1193_v63 = vadd.f32 %v2856_v17, %v1192_v61  ;;  %v1649_v11 = vmax.f32 %v1412_v46, %v1518_v3 }
 0x1d6   :  { %vm873_vm10 = vcmp.gt.f32.partialorder %v782_v60, 0.0  ;;  %v921_v2 = vmul.f32 0.01, %v782_v60  ;;  %2362 = vmatmul.msk.f32.gmra.mxu3 %vm541_vm3, %v527_v1 }
 0x1d7   :  { %vm1318_vm11 = vcmp.gt.f32.partialorder %v1193_v63, 0.0  ;;  %v1366_v4 = vmul.f32 0.01, %v1193_v63  ;;  %v1751_v24 = vrot.slane %v1649_v11, 2 }
 0x1d8   :  { %v969_v6 = vsel %vm873_vm10, %v782_v60, %v921_v2 }
 0x1d9   :  { %v1414_v9 = vsel %vm1318_vm11, %v1193_v63, %v1366_v4  ;;  %2394 = vmatmul.msk.f32.gmra.mxu2 %vm1003_vm8, %v969_v6  ;;  %v1752_v35 = vsel %vm224_vm0, %v1749_v7, %v1751_v24  ;;  %v530_v4 = vsel %vm434_vm1, %v381_v21, %v482_v54 }
 0x1da   :  { %v1519_v12 = vrot.slane %v1414_v9, 1  ;;  %v1884_v46 = vmax.f32 %v1648_v5, %v1752_v35  ;;  %v483_v5 = vmul.f32 0.01, %v384_v25 }
 0x1db   :  { %v784_v15 = vpop.f32.mrf.mxu1 }
 0x1dc   :  { %v1520_v16 = vsel %vm1501_vm9, %v1517_v50, %v1519_v12  ;;  %v785_v18 = vadd.f32 %v2711_v49, %v784_v15  ;;  %v1195_v19 = vpop.f32.mrf.mxu2  ;;  %v1986_v60 = vrot.slane %v1884_v46, 4  ;;  %v531_v21 = vsel %vm435_vm7, %v384_v25, %v483_v5 }
 0x1dd   :  { %v1650_v22 = vmax.f32 %v1413_v55, %v1520_v16  ;;  %v1196_v14 = vadd.f32 %v2856_v17, %v1195_v19  ;;  %v1984_v55 = vrot.slane %v1883_v39, 4 }
 0x1de   :  { %vm874_vm13 = vcmp.gt.f32.partialorder %v785_v18, 0.0  ;;  %v922_v26 = vmul.f32 0.01, %v785_v18  ;;  %2363 = vmatmul.msk.f32.gmra.mxu3 %vm541_vm3, %v528_v23 }
 0x1df   :  { %v1753_v28 = vrot.slane %v1650_v22, 2  ;;  %vm1319_vm14 = vcmp.gt.f32.partialorder %v1196_v14, 0.0  ;;  %v1367_v29 = vmul.f32 0.01, %v1196_v14  ;;  %v1985_v2 = vsel %vm1974_vm6, %v1982_v38, %v1984_v55 }
 0x1e0   :  { %v970_v49 = vsel %vm874_vm13, %v785_v18, %v922_v26  ;;  %v1987_v7 = vsel %vm1974_vm6, %v1984_v55, %v1986_v60 }
 0x1e1   :  { %v1415_v34 = vsel %vm1319_vm14, %v1196_v14, %v1367_v29  ;;  %2395 = vmatmul.msk.f32.gmra.mxu2 %vm1003_vm8, %v970_v49  ;;  %v1754_v36 = vsel %vm224_vm0, %v1751_v24, %v1753_v28  ;;  %v2119_v14 = vmax.f32 %v2948_v37, %v1985_v2  ;;  %v2120_v26 = vmax.f32 %v1883_v39, %v1987_v7 }
 0x1e2   :  { %v1521_v32 = vrot.slane %v1415_v34, 1  ;;  %v1885_v47 = vmax.f32 %v1649_v11, %v1754_v36 }
 0x1e3   :  { %v787_v40 = vpop.f32.mrf.mxu1  ;;  %v2165_v37 = vmax.f32 %v2958_v52, %v2119_v14 }
 0x1e4   :  { %v1522_v41 = vsel %vm1501_vm9, %v1519_v12, %v1521_v32  ;;  %v788_v42 = vadd.f32 %v2991_v33, %v787_v40  ;;  %v1198_v43 = vpop.f32.mrf.mxu2  ;;  %v1988_v61 = vrot.slane %v1885_v47, 4  ;;  %v386_v12 = vpop.f32.mrf.mxu3 }
 0x1e5   :  { %v1651_v48 = vmax.f32 %v1414_v9, %v1522_v41  ;;  %v1199_v51 = vadd.f32 %v2856_v17, %v1198_v43  ;;  %v387_v23 = vadd.f32 %v2907_v44, %v386_v12 }
 0x1e6   :  { %vm875_vm2 = vcmp.gt.f32.partialorder %v788_v42, 0.0  ;;  %v923_v53 = vmul.f32 0.01, %v788_v42  ;;  %2364 = vmatmul.msk.f32.gmra.mxu3 %vm541_vm3, %v529_v45  ;;  %v1989_v16 = vsel %vm1974_vm6, %v1986_v60, %v1988_v61 }
 0x1e7   :  { %v1755_v56 = vrot.slane %v1651_v48, 2  ;;  %vm1320_vm4 = vcmp.gt.f32.partialorder %v1199_v51, 0.0  ;;  %v1368_v50 = vmul.f32 0.01, %v1199_v51  ;;  %v484_v27 = vmul.f32 0.01, %v387_v23 }
 0x1e8   :  { %v971_v58 = vsel %vm875_vm2, %v788_v42, %v923_v53  ;;  %vm436_vm13 = vcmp.gt.f32.partialorder %v387_v23, 0.0 }
 0x1e9   :  { %v1756_v62 = vsel %vm224_vm0, %v1753_v28, %v1755_v56  ;;  %v1416_v63 = vsel %vm1320_vm4, %v1199_v51, %v1368_v50  ;;  %2396 = vmatmul.msk.f32.gmra.mxu2 %vm1003_vm8, %v971_v58  ;;  %v2121_v28 = vmax.f32 %v1884_v46, %v1989_v16  ;;  %v2166_v50 = vmax.f32 %v2119_v14, %v2120_v26 }
 0x1ea   :  { %v1523_v0 = vrot.slane %v1416_v63, 1  ;;  %v1886_v1 = vmax.f32 %v1650_v22, %v1756_v62  ;;  %v532_v12 = vsel %vm436_vm13, %v387_v23, %v484_v27 }
 0x1eb   :  { %v790_v3 = vpop.f32.mrf.mxu1  ;;  %v2167_v41 = vmax.f32 %v2120_v26, %v2121_v28 }
 0x1ec   :  { %v1524_v6 = vsel %vm1501_vm9, %v1521_v32, %v1523_v0  ;;  %v1653_v8 = vmax.f32 %v1416_v63, %v1523_v0  ;;  %v1990_v9 = vrot.slane %v1886_v1, 4  ;;  %v791_v10 = vadd.f32 %v2991_v33, %v790_v3  ;;  %v1201_v11 = vpop.f32.mrf.mxu2 }
 0x1ed   :  { %v1652_v15 = vmax.f32 %v1415_v34, %v1524_v6  ;;  %v1202_v18 = vadd.f32 %v2856_v17, %v1201_v11  ;;  %v2204_v0 = vmax.f32 %v2165_v37, %v2167_v41 }
 0x1ee   :  { %v1759_v19 = vrot.slane %v1653_v8, 2  ;;  %v1991_v38 = vsel %vm1974_vm6, %v1988_v61, %v1990_v9  ;;  %vm876_vm5 = vcmp.gt.f32.partialorder %v791_v10, 0.0  ;;  %v924_v20 = vmul.f32 0.01, %v791_v10  ;;  %2365 = vmatmul.msk.f32.gmra.mxu3 %vm541_vm3, %v530_v4 }
 0x1ef   :  { %v1757_v22 = vrot.slane %v1652_v15, 2  ;;  %v2122_v31 = vmax.f32 %v1885_v47, %v1991_v38  ;;  %v1369_v34 = vmul.f32 0.01, %v1202_v18  ;;  %vm1321_vm10 = vcmp.gt.f32.partialorder %v1202_v18, 0.0 }
 0x1f0   :  { %v1889_v24 = vmax.f32 %v1653_v8, %v1759_v19  ;;  %v972_v29 = vsel %vm876_vm5, %v791_v10, %v924_v20 }
 0x1f1   :  { %v1758_v30 = vsel %vm224_vm0, %v1755_v56, %v1757_v22  ;;  %v1760_v49 = vsel %vm224_vm0, %v1757_v22, %v1759_v19  ;;  %2397 = vmatmul.msk.f32.gmra.mxu2 %vm1003_vm8, %v972_v29  ;;  %v2168_v46 = vmax.f32 %v2121_v28, %v2122_v31  ;;  %v1417_v47 = vsel %vm1321_vm10, %v1202_v18, %v1369_v34 }
 0x1f2   :  { %v1887_v35 = vmax.f32 %v1651_v48, %v1758_v30  ;;  %v1888_v36 = vmax.f32 %v1652_v15, %v1760_v49  ;;  %v1996_v32 = vrot.slane %v1889_v24, 4  ;;  %v1525_v2 = vrot.slane %v1417_v47, 1 }
 0x1f3   :  { %v793_v44 = vpop.f32.mrf.mxu1  ;;  %v2205_v5 = vmax.f32 %v2166_v50, %v2168_v46 }
 0x1f4   :  { %v1992_v39 = vrot.slane %v1887_v35, 4  ;;  %v1994_v40 = vrot.slane %v1888_v36, 4  ;;  %v794_v42 = vadd.f32 %v2991_v33, %v793_v44  ;;  %v1204_v43 = vpop.f32.mrf.mxu2  ;;  %v2126_v45 = vmax.f32 %v1889_v24, %v1996_v32 }
 0x1f5   :  { %v1205_v48 = vadd.f32 %v2856_v17, %v1204_v43  ;;  %v2223_v24 = vmax.f32 %v2203_v59, %v2205_v5 }
 0x1f6   :  { %v1993_v51 = vsel %vm1974_vm6, %v1990_v9, %v1992_v39  ;;  %v1995_v53 = vsel %vm1974_vm6, %v1992_v39, %v1994_v40  ;;  %v1997_v52 = vsel %vm1974_vm6, %v1994_v40, %v1996_v32  ;;  %vm877_vm11 = vcmp.gt.f32.partialorder %v794_v42, 0.0  ;;  %2366 = vmatmul.msk.f32.gmra.mxu3 %vm541_vm3, %v531_v21 }
 0x1f7   :  { %v2123_v25 = vmax.f32 %v1886_v1, %v1993_v51  ;;  %v2124_v54 = vmax.f32 %v1887_v35, %v1995_v53  ;;  %v2125_v55 = vmax.f32 %v1888_v36, %v1997_v52  ;;  %v925_v56 = vmul.f32 0.01, %v794_v42 }
 0x1f8   :  { %vm1322_vm12 = vcmp.gt.f32.partialorder %v1205_v48, 0.0  ;;  %v1370_v58 = vmul.f32 0.01, %v1205_v48 }
 0x1f9   :  { %v2169_v60 = vmax.f32 %v2122_v31, %v2123_v25  ;;  %v2170_v61 = vmax.f32 %v2123_v25, %v2124_v54  ;;  %v2171_v62 = vmax.f32 %v2124_v54, %v2125_v55  ;;  %v2172_v63 = vmax.f32 %v2125_v55, %v2126_v45 }
 0x1fa   :  { %v1418_v3 = vsel %vm1322_vm12, %v1205_v48, %v1370_v58  ;;  %v973_v4 = vsel %vm877_vm11, %v794_v42, %v925_v56 }
 0x1fb   :  { %v2206_v6 = vmax.f32 %v2169_v60, %v2171_v62  ;;  %v2207_v8 = vmax.f32 %v2170_v61, %v2172_v63  ;;  %v1526_v1 = vrot.slane %v1418_v3, 1  ;;  %2398 = vmatmul.msk.f32.gmra.mxu2 %vm1003_vm8, %v973_v4  ;;  %v796_v9 = vpop.f32.mrf.mxu1 }
 0x1fc   :  { %v797_v10 = vadd.f32 %v2991_v33, %v796_v9  ;;  %v1207_v11 = vpop.f32.mrf.mxu2 }
 0x1fd   :  { %v2224_v15 = vmax.f32 %v2204_v0, %v2206_v6  ;;  %v2225_v7 = vmax.f32 %v2205_v5, %v2207_v8  ;;  %v1527_v16 = vsel %vm1501_vm9, %v1525_v2, %v1526_v1  ;;  %v1208_v18 = vadd.f32 %v2856_v17, %v1207_v11 }
 0x1fe   :  { %v1654_v19 = vmax.f32 %v1417_v47, %v1527_v16  ;;  %vm878_vm14 = vcmp.gt.f32.partialorder %v797_v10, 0.0  ;;  %v926_v38 = vmul.f32 0.01, %v797_v10  ;;  %2367 = vmatmul.msk.f32.gmra.mxu3 %vm541_vm3, %v532_v12 }
 0x1ff   :  { %v2243_v20 = vrot.slane %v2224_v15, 2  ;;  %v2244_v22 = vrot.slane %v2225_v7, 2  ;;  %vm1323_vm15 = vcmp.gt.f32.partialorder %v1208_v18, 0.0  ;;  %v1371_v14 = vmul.f32 0.01, %v1208_v18 }
 0x200   :  { %v974_v23 = vsel %vm878_vm14, %v797_v10, %v926_v38  ;;  %v1761_v36 = vrot.slane %v1654_v19, 2 }
 0x201   :  { %v2245_v26 = vsel %vm224_vm0, %v2243_v20, %v2244_v22  ;;  %v1419_v28 = vsel %vm1323_vm15, %v1208_v18, %v1371_v14 }
 0x202   :  { %v2259_v29 = vmax.f32 %v2223_v24, %v2245_v26  ;;  %v1528_v30 = vrot.slane %v1419_v28, 1 }
 0x203   :  { %2399 = vmatmul.msk.f32.gmra.mxu2 %vm1003_vm8, %v974_v23  ;;  %v799_v49 = vpop.f32.mrf.mxu1 }
 0x204   :  { %2263 = vst [vmem:[%s3295_s7] sm:$0x7f] %v2259_v29  ;;  %v1529_v31 = vsel %vm1501_vm9, %v1526_v1, %v1528_v30  ;;  %v800_v34 = vadd.f32 %v2991_v33, %v799_v49  ;;  %v1210_v35 = vpop.f32.mrf.mxu2 }
 0x205   :  { %v1655_v13 = vmax.f32 %v1418_v3, %v1529_v31  ;;  %v1211_v57 = vadd.f32 %v2856_v17, %v1210_v35 }
 0x206   :  { %vm879_vm3 = vcmp.gt.f32.partialorder %v800_v34, 0.0  ;;  %v927_v59 = vmul.f32 0.01, %v800_v34 }
 0x207   :  { %v1762_v32 = vrot.slane %v1655_v13, 2  ;;  %vm1324_vm2 = vcmp.gt.f32.partialorder %v1211_v57, 0.0  ;;  %v1372_v37 = vmul.f32 0.01, %v1211_v57 }
 0x208   :  { %v975_v44 = vsel %vm879_vm3, %v800_v34, %v927_v59 }
 0x209   :  { %v1763_v21 = vsel %vm224_vm0, %v1761_v36, %v1762_v32  ;;  %v1420_v27 = vsel %vm1324_vm2, %v1211_v57, %v1372_v37 }
 0x20a   :  { %v1890_v39 = vmax.f32 %v1654_v19, %v1763_v21  ;;  %v1530_v40 = vrot.slane %v1420_v27, 1 }
 0x20b   :  { %2400 = vmatmul.msk.f32.gmra.mxu2 %vm1003_vm8, %v975_v44  ;;  %v802_v41 = vpop.f32.mrf.mxu1 }
 0x20c   :  { %v1531_v42 = vsel %vm1501_vm9, %v1528_v30, %v1530_v40  ;;  %v803_v43 = vadd.f32 %v2991_v33, %v802_v41  ;;  %v1213_v45 = vpop.f32.mrf.mxu2  ;;  %v1998_v58 = vrot.slane %v1890_v39, 4 }
 0x20d   :  { %v1656_v46 = vmax.f32 %v1419_v28, %v1531_v42  ;;  %v1214_v47 = vadd.f32 %v2856_v17, %v1213_v45 }
 0x20e   :  { %vm880_vm4 = vcmp.gt.f32.partialorder %v803_v43, 0.0  ;;  %v928_v48 = vmul.f32 0.01, %v803_v43 }
 0x20f   :  { %v1764_v51 = vrot.slane %v1656_v46, 2  ;;  %vm1325_vm1 = vcmp.gt.f32.partialorder %v1214_v47, 0.0  ;;  %v1373_v53 = vmul.f32 0.01, %v1214_v47 }
 0x210   :  { %v976_v52 = vsel %vm880_vm4, %v803_v43, %v928_v48 }
 0x211   :  { %v1765_v25 = vsel %vm224_vm0, %v1762_v32, %v1764_v51  ;;  %v1421_v54 = vsel %vm1325_vm1, %v1214_v47, %v1373_v53 }
 0x212   :  { %v1891_v55 = vmax.f32 %v1655_v13, %v1765_v25  ;;  %v1532_v56 = vrot.slane %v1421_v54, 1 }
 0x213   :  { %2401 = vmatmul.msk.f32.gmra.mxu2 %vm1003_vm8, %v976_v52  ;;  %v805_v50 = vpop.f32.mrf.mxu1 }
 0x214   :  { %v1999_v60 = vrot.slane %v1891_v55, 4  ;;  %v1533_v61 = vsel %vm1501_vm9, %v1530_v40, %v1532_v56  ;;  %v806_v62 = vadd.f32 %v2991_v33, %v805_v50  ;;  %v1216_v63 = vpop.f32.mrf.mxu2 }
 0x215   :  { %v1657_v0 = vmax.f32 %v1420_v27, %v1533_v61  ;;  %v1217_v2 = vadd.f32 %v2856_v17, %v1216_v63 }
 0x216   :  { %v2000_v3 = vsel %vm1974_vm6, %v1998_v58, %v1999_v60  ;;  %vm881_vm5 = vcmp.gt.f32.partialorder %v806_v62, 0.0  ;;  %v929_v4 = vmul.f32 0.01, %v806_v62 }
 0x217   :  { %v1766_v5 = vrot.slane %v1657_v0, 2  ;;  %vm1326_vm7 = vcmp.gt.f32.partialorder %v1217_v2, 0.0  ;;  %v1374_v6 = vmul.f32 0.01, %v1217_v2  ;;  %v2127_v8 = vmax.f32 %v1890_v39, %v2000_v3 }
 0x218   :  { %v977_v1 = vsel %vm881_vm5, %v806_v62, %v929_v4 }
 0x219   :  { %v1767_v9 = vsel %vm224_vm0, %v1764_v51, %v1766_v5  ;;  %v1422_v10 = vsel %vm1326_vm7, %v1217_v2, %v1374_v6 }
 0x21a   :  { %v1892_v11 = vmax.f32 %v1656_v46, %v1767_v9  ;;  %v1534_v12 = vrot.slane %v1422_v10, 1 }
 0x21b   :  { %2402 = vmatmul.msk.f32.gmra.mxu2 %vm1003_vm8, %v977_v1  ;;  %v808_v15 = vpop.f32.mrf.mxu1 }
 0x21c   :  { %v2001_v7 = vrot.slane %v1892_v11, 4  ;;  %v1535_v16 = vsel %vm1501_vm9, %v1532_v56, %v1534_v12  ;;  %v809_v18 = vadd.f32 %v2991_v33, %v808_v15  ;;  %v1219_v19 = vpop.f32.mrf.mxu2 }
 0x21d   :  { %v1658_v38 = vmax.f32 %v1421_v54, %v1535_v16  ;;  %v1220_v20 = vadd.f32 %v2856_v17, %v1219_v19 }
 0x21e   :  { %v2002_v22 = vsel %vm1974_vm6, %v1999_v60, %v2001_v7  ;;  %vm882_vm10 = vcmp.gt.f32.partialorder %v809_v18, 0.0  ;;  %v930_v14 = vmul.f32 0.01, %v809_v18 }
 0x21f   :  { %v1768_v24 = vrot.slane %v1658_v38, 2  ;;  %vm1327_vm11 = vcmp.gt.f32.partialorder %v1220_v20, 0.0  ;;  %v1375_v23 = vmul.f32 0.01, %v1220_v20  ;;  %v2128_v26 = vmax.f32 %v1891_v55, %v2002_v22 }
 0x220   :  { %v978_v28 = vsel %vm882_vm10, %v809_v18, %v930_v14 }
 0x221   :  { %v1769_v29 = vsel %vm224_vm0, %v1766_v5, %v1768_v24  ;;  %v1423_v30 = vsel %vm1327_vm11, %v1220_v20, %v1375_v23  ;;  %2403 = vmatmul.msk.f32.vlgmr.msra.gmra.mxu3 %vm1003_vm8, %v978_v28  ;;  %v3059_v49 = vmax.f32 %v2127_v8, %v2128_v26 }
 0x222   :  { %v1893_v31 = vmax.f32 %v1657_v0, %v1769_v29  ;;  %v1536_v34 = vrot.slane %v1423_v30, 1 }
 0x224   :  { %v2003_v35 = vrot.slane %v1893_v31, 4  ;;  %v1537_v13 = vsel %vm1501_vm9, %v1534_v12, %v1536_v34  ;;  %v1222_v57 = vpop.f32.mrf.mxu2 }
 0x225   :  { %v3062_v59 = vmax.f32 %v1422_v10, %v1537_v13  ;;  %v1223_v44 = vadd.f32 %v2856_v17, %v1222_v57 }
 0x226   :  { %v2004_v36 = vsel %vm1974_vm6, %v2001_v7, %v2003_v35  ;;  %v3096_v7 = vld [vmem:[%s3294_s6] ss:$0 sm:$0xff] }
 0x227   :  { %v1770_v32 = vrot.slane %v3062_v59, 2  ;;  %v2129_v37 = vmax.f32 %v1892_v11, %v2004_v36  ;;  %v1376_v42 = vmul.f32 0.01, %v1223_v44  ;;  %vm1328_vm13 = vcmp.gt.f32.partialorder %v1223_v44, 0.0 }
 0x229   :  { %v1771_v21 = vsel %vm224_vm0, %v1768_v24, %v1770_v32  ;;  %v811_v27 = vpop.f32.mrf.mxu3  ;;  %v1424_v52 = vsel %vm1328_vm13, %v1223_v44, %v1376_v42 }
 0x22a   :  { %v3070_v39 = vmax.f32 %v1658_v38, %v1771_v21  ;;  %v812_v40 = vadd.f32 %v2991_v33, %v811_v27  ;;  %v1538_v50 = vrot.slane %v1424_v52, 1 }
 0x22c   :  { %v2005_v41 = vrot.slane %v3070_v39, 4  ;;  %v931_v43 = vmul.f32 0.01, %v812_v40  ;;  %v1225_v45 = vpop.f32.mrf.mxu2  ;;  %vm883_vm12 = vcmp.gt.f32.partialorder %v812_v40, 0.0  ;;  %v1539_v2 = vsel %vm1501_vm9, %v1536_v34, %v1538_v50 }
 0x22d   :  { %v1226_v46 = vadd.f32 %v2856_v17, %v1225_v45  ;;  %v1660_v8 = vmax.f32 %v1423_v30, %v1539_v2 }
 0x22e   :  { %v2006_v47 = vsel %vm1974_vm6, %v2003_v35, %v2005_v41  ;;  %v979_v48 = vsel %vm883_vm12, %v812_v40, %v931_v43 }
 0x22f   :  { %vm1329_vm14 = vcmp.gt.f32.partialorder %v1226_v46, 0.0  ;;  %v1377_v51 = vmul.f32 0.01, %v1226_v46  ;;  %2404 = vmatmul.msk.f32.gmra.mxu3 %vm1003_vm8, %v979_v48  ;;  %v3079_v53 = vmax.f32 %v1893_v31, %v2006_v47  ;;  %v1772_v18 = vrot.slane %v1660_v8, 2 }
 0x231   :  { %v1425_v25 = vsel %vm1329_vm14, %v1226_v46, %v1377_v51  ;;  %v814_v54 = vpop.f32.mrf.mxu3  ;;  %v3082_v55 = vmax.f32 %v2129_v37, %v3079_v53  ;;  %v1773_v29 = vsel %vm224_vm0, %v1770_v32, %v1772_v18 }
 0x232   :  { %v815_v56 = vadd.f32 %v2991_v33, %v814_v54  ;;  %v1540_v60 = vrot.slane %v1425_v25, 1  ;;  %v1895_v21 = vmax.f32 %v3062_v59, %v1773_v29 }
 0x233   :  { %v2208_v58 = vmax.f32 %v3059_v49, %v3082_v55 }
 0x234   :  { %vm884_vm15 = vcmp.gt.f32.partialorder %v815_v56, 0.0  ;;  %v932_v61 = vmul.f32 0.01, %v815_v56  ;;  %v1228_v62 = vpop.f32.mrf.mxu2  ;;  %v1541_v4 = vsel %vm1501_vm9, %v1538_v50, %v1540_v60 }
 0x235   :  { %v1229_v63 = vadd.f32 %v2856_v17, %v1228_v62  ;;  %v1661_v10 = vmax.f32 %v1424_v52, %v1541_v4  ;;  %v2007_v52 = vrot.slane %v1895_v21, 4 }
 0x236   :  { %v980_v0 = vsel %vm884_vm15, %v815_v56, %v932_v61 }
 0x237   :  { %vm1330_vm3 = vcmp.gt.f32.partialorder %v1229_v63, 0.0  ;;  %v1378_v3 = vmul.f32 0.01, %v1229_v63  ;;  %2405 = vmatmul.msk.f32.gmra.mxu3 %vm1003_vm8, %v980_v0  ;;  %v1774_v38 = vrot.slane %v1661_v10, 2  ;;  %v2008_v4 = vsel %vm1974_vm6, %v2005_v41, %v2007_v52 }
 0x239   :  { %v1426_v5 = vsel %vm1330_vm3, %v1229_v63, %v1378_v3  ;;  %v817_v6 = vpop.f32.mrf.mxu3  ;;  %v1775_v30 = vsel %vm224_vm0, %v1772_v18, %v1774_v38 }
 0x23a   :  { %v1542_v1 = vrot.slane %v1426_v5, 1  ;;  %v818_v9 = vadd.f32 %v2991_v33, %v817_v6  ;;  %v1896_v37 = vmax.f32 %v1660_v8, %v1775_v30 }
 0x23c   :  { %v1543_v11 = vsel %vm1501_vm9, %v1540_v60, %v1542_v1  ;;  %vm885_vm2 = vcmp.gt.f32.partialorder %v818_v9, 0.0  ;;  %v933_v17 = vmul.f32 0.01, %v818_v9  ;;  %v1231_v12 = vpop.f32.mrf.mxu2  ;;  %v2009_v46 = vrot.slane %v1896_v37, 4 }
 0x23d   :  { %v1662_v15 = vmax.f32 %v1425_v25, %v1543_v11  ;;  %v1232_v16 = vadd.f32 %v3096_v7, %v1231_v12 }
 0x23e   :  { %v981_v19 = vsel %vm885_vm2, %v818_v9, %v933_v17  ;;  %v2010_v0 = vsel %vm1974_vm6, %v2007_v52, %v2009_v46 }
 0x23f   :  { %v1776_v20 = vrot.slane %v1662_v15, 2  ;;  %vm1331_vm4 = vcmp.gt.f32.partialorder %v1232_v16, 0.0  ;;  %v1379_v22 = vmul.f32 0.01, %v1232_v16  ;;  %2406 = vmatmul.msk.f32.gmra.mxu3 %vm1003_vm8, %v981_v19  ;;  %v2132_v11 = vmax.f32 %v1895_v21, %v2010_v0 }
 0x240   :  { %v2131_v19 = vmax.f32 %v3070_v39, %v2008_v4 }
 0x241   :  { %v1777_v14 = vsel %vm224_vm0, %v1774_v38, %v1776_v20  ;;  %v1427_v24 = vsel %vm1331_vm4, %v1232_v16, %v1379_v22  ;;  %v820_v23 = vpop.f32.mrf.mxu3 }
 0x242   :  { %v1544_v26 = vrot.slane %v1427_v24, 1  ;;  %v821_v28 = vadd.f32 %v2991_v33, %v820_v23  ;;  %v1897_v31 = vmax.f32 %v1661_v10, %v1777_v14 }
 0x244   :  { %v1545_v34 = vsel %vm1501_vm9, %v1542_v1, %v1544_v26  ;;  %vm886_vm1 = vcmp.gt.f32.partialorder %v821_v28, 0.0  ;;  %v934_v35 = vmul.f32 0.01, %v821_v28  ;;  %v1234_v13 = vpop.f32.mrf.mxu2  ;;  %v2011_v32 = vrot.slane %v1897_v31, 4 }
 0x245   :  { %v1663_v57 = vmax.f32 %v1426_v5, %v1545_v34  ;;  %v1235_v36 = vadd.f32 %v3096_v7, %v1234_v13 }
 0x246   :  { %v982_v44 = vsel %vm886_vm1, %v821_v28, %v934_v35  ;;  %v2012_v56 = vsel %vm1974_vm6, %v2009_v46, %v2011_v32 }
 0x247   :  { %v1778_v27 = vrot.slane %v1663_v57, 2  ;;  %vm1332_vm5 = vcmp.gt.f32.partialorder %v1235_v36, 0.0  ;;  %v1380_v40 = vmul.f32 0.01, %v1235_v36  ;;  %2407 = vmatmul.msk.f32.gmra.mxu3 %vm1003_vm8, %v982_v44  ;;  %v2133_v6 = vmax.f32 %v1896_v37, %v2012_v56 }
 0x249   :  { %v1779_v42 = vsel %vm224_vm0, %v1776_v20, %v1778_v27  ;;  %v1428_v43 = vsel %vm1332_vm5, %v1235_v36, %v1380_v40  ;;  %v823_v45 = vpop.f32.mrf.mxu3  ;;  %v2177_v22 = vmax.f32 %v2132_v11, %v2133_v6  ;;  %v2176_v36 = vmax.f32 %v2131_v19, %v2132_v11 }
 0x24a   :  { %v1898_v47 = vmax.f32 %v1662_v15, %v1779_v42  ;;  %v1546_v48 = vrot.slane %v1428_v43, 1  ;;  %v824_v51 = vadd.f32 %v2991_v33, %v823_v45 }
 0x24c   :  { %v2013_v25 = vrot.slane %v1898_v47, 4  ;;  %v1547_v54 = vsel %vm1501_vm9, %v1544_v26, %v1546_v48  ;;  %v1665_v59 = vmax.f32 %v1428_v43, %v1546_v48  ;;  %v1237_v50 = vpop.f32.mrf.mxu2  ;;  %vm887_vm7 = vcmp.gt.f32.partialorder %v824_v51, 0.0 }
 0x24d   :  { %v1664_v60 = vmax.f32 %v1427_v24, %v1547_v54  ;;  %v935_v61 = vmul.f32 0.01, %v824_v51  ;;  %v1238_v62 = vadd.f32 %v3096_v7, %v1237_v50 }
 0x24e   :  { %v1782_v63 = vrot.slane %v1665_v59, 2  ;;  %v2014_v2 = vsel %vm1974_vm6, %v2011_v32, %v2013_v25 }
 0x24f   :  { %v1780_v3 = vrot.slane %v1664_v60, 2  ;;  %v2134_v8 = vmax.f32 %v1897_v31, %v2014_v2  ;;  %v983_v1 = vsel %vm887_vm7, %v824_v51, %v935_v61  ;;  %v1381_v17 = vmul.f32 0.01, %v1238_v62 }
 0x250   :  { %v1901_v5 = vmax.f32 %v1665_v59, %v1782_v63  ;;  %2408 = vmatmul.msk.f32.gmra.mxu3 %vm1003_vm8, %v983_v1  ;;  %vm1333_vm10 = vcmp.gt.f32.partialorder %v1238_v62, 0.0 }
 0x251   :  { %v1781_v9 = vsel %vm224_vm0, %v1778_v27, %v1780_v3  ;;  %v1783_v10 = vsel %vm224_vm0, %v1780_v3, %v1782_v63  ;;  %v826_v12 = vpop.f32.mrf.mxu3  ;;  %v2178_v14 = vmax.f32 %v2133_v6, %v2134_v8  ;;  %v1429_v23 = vsel %vm1333_vm10, %v1238_v62, %v1381_v17 }
 0x252   :  { %v1899_v15 = vmax.f32 %v1663_v57, %v1781_v9  ;;  %v1900_v16 = vmax.f32 %v1664_v60, %v1783_v10  ;;  %v2019_v18 = vrot.slane %v1901_v5, 4  ;;  %v827_v41 = vadd.f32 %v2991_v33, %v826_v12 }
 0x253   :  { %v2175_v57 = vmax.f32 %v3079_v53, %v2131_v19  ;;  %v1548_v45 = vrot.slane %v1429_v23, 1  ;;  %v2210_v48 = vmax.f32 %v2176_v36, %v2178_v14 }
 0x254   :  { %v2015_v38 = vrot.slane %v1899_v15, 4  ;;  %v2017_v20 = vrot.slane %v1900_v16, 4  ;;  %v1240_v24 = vpop.f32.mrf.mxu2  ;;  %vm888_vm11 = vcmp.gt.f32.partialorder %v827_v41, 0.0  ;;  %v936_v26 = vmul.f32 0.01, %v827_v41 }
 0x255   :  { %v1241_v28 = vadd.f32 %v3096_v7, %v1240_v24  ;;  %v2138_v34 = vmax.f32 %v1901_v5, %v2019_v18  ;;  %v2209_v43 = vmax.f32 %v2175_v57, %v2177_v22  ;;  %v2226_v3 = vmax.f32 %v2208_v58, %v2210_v48 }
 0x256   :  { %v2016_v29 = vsel %vm1974_vm6, %v2013_v25, %v2015_v38  ;;  %v2018_v30 = vsel %vm1974_vm6, %v2015_v38, %v2017_v20  ;;  %v2020_v31 = vsel %vm1974_vm6, %v2017_v20, %v2019_v18  ;;  %v984_v44 = vsel %vm888_vm11, %v827_v41, %v936_v26 }
 0x257   :  { %v2135_v39 = vmax.f32 %v1898_v47, %v2016_v29  ;;  %v2136_v35 = vmax.f32 %v1899_v15, %v2018_v30  ;;  %v2137_v13 = vmax.f32 %v1900_v16, %v2020_v31  ;;  %vm1334_vm12 = vcmp.gt.f32.partialorder %v1241_v28, 0.0 }
 0x258   :  { %v1382_v37 = vmul.f32 0.01, %v1241_v28  ;;  %2409 = vmatmul.msk.f32.gmra.mxu3 %vm1003_vm8, %v984_v44 }
 0x259   :  { %v2179_v21 = vmax.f32 %v2134_v8, %v2135_v39  ;;  %v2180_v27 = vmax.f32 %v2135_v39, %v2136_v35  ;;  %v2181_v40 = vmax.f32 %v2136_v35, %v2137_v13  ;;  %v2182_v32 = vmax.f32 %v2137_v13, %v2138_v34  ;;  %v829_v42 = vpop.f32.mrf.mxu3 }
 0x25a   :  { %v1430_v46 = vsel %vm1334_vm12, %v1241_v28, %v1382_v37  ;;  %v830_v47 = vadd.f32 %v2991_v33, %v829_v42 }
 0x25b   :  { %v2211_v51 = vmax.f32 %v2179_v21, %v2181_v40  ;;  %v2212_v52 = vmax.f32 %v2180_v27, %v2182_v32  ;;  %v1549_v25 = vrot.slane %v1430_v46, 1 }
 0x25c   :  { %vm889_vm13 = vcmp.gt.f32.partialorder %v830_v47, 0.0  ;;  %v937_v53 = vmul.f32 0.01, %v830_v47  ;;  %v1243_v54 = vpop.f32.mrf.mxu2 }
 0x25d   :  { %v2227_v59 = vmax.f32 %v2209_v43, %v2211_v51  ;;  %v2228_v56 = vmax.f32 %v2210_v48, %v2212_v52  ;;  %v1550_v50 = vsel %vm1501_vm9, %v1548_v45, %v1549_v25  ;;  %v1244_v60 = vadd.f32 %v3096_v7, %v1243_v54 }
 0x25e   :  { %v1666_v61 = vmax.f32 %v1429_v23, %v1550_v50  ;;  %v985_v62 = vsel %vm889_vm13, %v830_v47, %v937_v53 }
 0x25f   :  { %v2246_v63 = vrot.slane %v2227_v59, 2  ;;  %v2247_v0 = vrot.slane %v2228_v56, 2  ;;  %vm1335_vm14 = vcmp.gt.f32.partialorder %v1244_v60, 0.0  ;;  %v1383_v2 = vmul.f32 0.01, %v1244_v60 }
 0x260   :  { %2410 = vmatmul.msk.f32.gmra.mxu3 %vm1003_vm8, %v985_v62  ;;  %v1784_v12 = vrot.slane %v1666_v61, 2 }
 0x261   :  { %v2248_v4 = vsel %vm224_vm0, %v2246_v63, %v2247_v0  ;;  %v1431_v5 = vsel %vm1335_vm14, %v1244_v60, %v1383_v2  ;;  %v832_v6 = vpop.f32.mrf.mxu3 }
 0x262   :  { %v2260_v8 = vmax.f32 %v2226_v3, %v2248_v4  ;;  %v1551_v1 = vrot.slane %v1431_v5, 1  ;;  %v833_v9 = vadd.f32 %v2991_v33, %v832_v6 }
 0x264   :  { %2264 = vst [vmem:[%s3295_s7 + $0x8] sm:$0x7f] %v2260_v8  ;;  %v1552_v10 = vsel %vm1501_vm9, %v1549_v25, %v1551_v1  ;;  %vm890_vm15 = vcmp.gt.f32.partialorder %v833_v9, 0.0  ;;  %v938_v11 = vmul.f32 0.01, %v833_v9  ;;  %v1246_v49 = vpop.f32.mrf.mxu2 }
 0x265   :  { %v1667_v55 = vmax.f32 %v1430_v46, %v1552_v10  ;;  %v1247_v58 = vadd.f32 %v3096_v7, %v1246_v49 }
 0x266   :  { %v986_v17 = vsel %vm890_vm15, %v833_v9, %v938_v11 }
 0x267   :  { %v1785_v15 = vrot.slane %v1667_v55, 2  ;;  %vm1336_vm3 = vcmp.gt.f32.partialorder %v1247_v58, 0.0  ;;  %v1384_v16 = vmul.f32 0.01, %v1247_v58 }
 0x268   :  { %2411 = vmatmul.msk.f32.gmra.mxu3 %vm1003_vm8, %v986_v17 }
 0x269   :  { %v1786_v18 = vsel %vm224_vm0, %v1784_v12, %v1785_v15  ;;  %v1432_v19 = vsel %vm1336_vm3, %v1247_v58, %v1384_v16  ;;  %v835_v41 = vpop.f32.mrf.mxu3 }
 0x26a   :  { %v1902_v38 = vmax.f32 %v1666_v61, %v1786_v18  ;;  %v1553_v20 = vrot.slane %v1432_v19, 1  ;;  %v836_v22 = vadd.f32 %v2991_v33, %v835_v41 }
 0x26c   :  { %v1554_v14 = vsel %vm1501_vm9, %v1551_v1, %v1553_v20  ;;  %vm891_vm2 = vcmp.gt.f32.partialorder %v836_v22, 0.0  ;;  %v939_v24 = vmul.f32 0.01, %v836_v22  ;;  %v1249_v23 = vpop.f32.mrf.mxu2  ;;  %v2021_v37 = vrot.slane %v1902_v38, 4 }
 0x26d   :  { %v1668_v26 = vmax.f32 %v1431_v5, %v1554_v14  ;;  %v1250_v28 = vadd.f32 %v3096_v7, %v1249_v23 }
 0x26e   :  { %v987_v29 = vsel %vm891_vm2, %v836_v22, %v939_v24 }
 0x26f   :  { %v1787_v30 = vrot.slane %v1668_v26, 2  ;;  %vm1337_vm4 = vcmp.gt.f32.partialorder %v1250_v28, 0.0  ;;  %v1385_v31 = vmul.f32 0.01, %v1250_v28 }
 0x270   :  { %2412 = vmatmul.msk.f32.gmra.mxu3 %vm1003_vm8, %v987_v29 }
 0x271   :  { %v1788_v34 = vsel %vm224_vm0, %v1785_v15, %v1787_v30  ;;  %v1433_v39 = vsel %vm1337_vm4, %v1250_v28, %v1385_v31  ;;  %v838_v35 = vpop.f32.mrf.mxu3 }
 0x272   :  { %v1903_v13 = vmax.f32 %v1667_v55, %v1788_v34  ;;  %v1555_v57 = vrot.slane %v1433_v39, 1  ;;  %v839_v36 = vadd.f32 %v2991_v33, %v838_v35 }
 0x274   :  { %v2022_v44 = vrot.slane %v1903_v13, 4  ;;  %v1556_v21 = vsel %vm1501_vm9, %v1553_v20, %v1555_v57  ;;  %vm892_vm1 = vcmp.gt.f32.partialorder %v839_v36, 0.0  ;;  %v940_v27 = vmul.f32 0.01, %v839_v36  ;;  %v1252_v40 = vpop.f32.mrf.mxu2 }
 0x275   :  { %v1669_v32 = vmax.f32 %v1432_v19, %v1556_v21  ;;  %v1253_v42 = vadd.f32 %v3096_v7, %v1252_v40 }
 0x276   :  { %v2023_v43 = vsel %vm1974_vm6, %v2021_v37, %v2022_v44  ;;  %v988_v45 = vsel %vm892_vm1, %v839_v36, %v940_v27 }
 0x277   :  { %v1789_v46 = vrot.slane %v1669_v32, 2  ;;  %vm1338_vm5 = vcmp.gt.f32.partialorder %v1253_v42, 0.0  ;;  %v1386_v47 = vmul.f32 0.01, %v1253_v42  ;;  %v2139_v48 = vmax.f32 %v1902_v38, %v2023_v43 }
 0x278   :  { %2413 = vmatmul.msk.f32.gmra.mxu3 %vm1003_vm8, %v988_v45 }
 0x279   :  { %v1790_v51 = vsel %vm224_vm0, %v1787_v30, %v1789_v46  ;;  %v1434_v52 = vsel %vm1338_vm5, %v1253_v42, %v1386_v47  ;;  %v841_v25 = vpop.f32.mrf.mxu3 }
 0x27a   :  { %v1904_v53 = vmax.f32 %v1668_v26, %v1790_v51  ;;  %v1557_v54 = vrot.slane %v1434_v52, 1  ;;  %v842_v59 = vadd.f32 %v2991_v33, %v841_v25 }
 0x27c   :  { %v2024_v56 = vrot.slane %v1904_v53, 4  ;;  %v1558_v50 = vsel %vm1501_vm9, %v1555_v57, %v1557_v54  ;;  %vm893_vm7 = vcmp.gt.f32.partialorder %v842_v59, 0.0  ;;  %v941_v60 = vmul.f32 0.01, %v842_v59 }
 0x27d   :  { %v1670_v61 = vmax.f32 %v1433_v39, %v1558_v50 }
 0x27e   :  { %v2025_v62 = vsel %vm1974_vm6, %v2022_v44, %v2024_v56  ;;  %v1255_v63 = vpop.f32.mrf.mxu2  ;;  %v989_v0 = vsel %vm893_vm7, %v842_v59, %v941_v60 }
 0x27f   :  { %v1791_v2 = vrot.slane %v1670_v61, 2  ;;  %v1256_v3 = vadd.f32 %v3096_v7, %v1255_v63  ;;  %v2140_v4 = vmax.f32 %v1903_v13, %v2025_v62 }
 0x280   :  { %2414 = vmatmul.msk.f32.gmra.mxu3 %vm1003_vm8, %v989_v0 }
 0x281   :  { %vm1339_vm10 = vcmp.gt.f32.partialorder %v1256_v3, 0.0  ;;  %v1387_v5 = vmul.f32 0.01, %v1256_v3  ;;  %v844_v6 = vpop.f32.mrf.mxu3  ;;  %v3163_v8 = vmax.f32 %v2139_v48, %v2140_v4  ;;  %v1792_v1 = vsel %vm224_vm0, %v1789_v46, %v1791_v2 }
 0x282   :  { %v845_v9 = vadd.f32 %v2991_v33, %v844_v6  ;;  %v1905_v55 = vmax.f32 %v1669_v32, %v1792_v1 }
 0x283   :  { %v1435_v10 = vsel %vm1339_vm10, %v1256_v3, %v1387_v5 }
 0x284   :  { %v1559_v11 = vrot.slane %v1435_v10, 1  ;;  %vm894_vm11 = vcmp.gt.f32.partialorder %v845_v9, 0.0  ;;  %v942_v49 = vmul.f32 0.01, %v845_v9  ;;  %v2026_v16 = vrot.slane %v1905_v55, 4 }
 0x286   :  { %v1560_v58 = vsel %vm1501_vm9, %v1557_v54, %v1559_v11  ;;  %v1258_v17 = vpop.f32.mrf.mxu2  ;;  %v990_v12 = vsel %vm894_vm11, %v845_v9, %v942_v49  ;;  %v2027_v38 = vsel %vm1974_vm6, %v2024_v56, %v2026_v16 }
 0x287   :  { %v1671_v15 = vmax.f32 %v1434_v52, %v1560_v58  ;;  %v1259_v33 = vadd.f32 %v3096_v7, %v1258_v17  ;;  %v2141_v26 = vmax.f32 %v1904_v53, %v2027_v38 }
 0x288   :  { %2415 = vmatmul.msk.f32.gmra.mxu3 %vm1003_vm8, %v990_v12 }
 0x289   :  { %v1793_v18 = vrot.slane %v1671_v15, 2  ;;  %v1388_v23 = vmul.f32 0.01, %v1259_v33  ;;  %vm1340_vm8 = vcmp.gt.f32.partialorder %v1259_v33, 0.0 }
 0x28b   :  { %v1794_v19 = vsel %vm224_vm0, %v1791_v2, %v1793_v18  ;;  %v1436_v34 = vsel %vm1340_vm8, %v1259_v33, %v1388_v23 }
 0x28c   :  { %v3170_v41 = vmax.f32 %v1670_v61, %v1794_v19  ;;  %v1561_v57 = vrot.slane %v1436_v34, 1 }
 0x28e   :  { %v2028_v20 = vrot.slane %v3170_v41, 4  ;;  %v1261_v22 = vpop.f32.mrf.mxu2  ;;  %v1562_v21 = vsel %vm1501_vm9, %v1559_v11, %v1561_v57 }
 0x28f   :  { %v1262_v14 = vadd.f32 %v3096_v7, %v1261_v22  ;;  %v1672_v42 = vmax.f32 %v1435_v10, %v1562_v21 }
 0x290   :  { %v2029_v24 = vsel %vm1974_vm6, %v2026_v16, %v2028_v20 }
 0x291   :  { %vm1341_vm12 = vcmp.gt.f32.partialorder %v1262_v14, 0.0  ;;  %v1389_v28 = vmul.f32 0.01, %v1262_v14  ;;  %v3179_v29 = vmax.f32 %v1905_v55, %v2029_v24  ;;  %v1795_v25 = vrot.slane %v1672_v42, 2 }
 0x293   :  { %v1437_v30 = vsel %vm1341_vm12, %v1262_v14, %v1389_v28  ;;  %v3182_v31 = vmax.f32 %v2141_v26, %v3179_v29  ;;  %v1796_v61 = vsel %vm224_vm0, %v1793_v18, %v1795_v25 }
 0x294   :  { %v1563_v35 = vrot.slane %v1437_v30, 1  ;;  %v1907_v4 = vmax.f32 %v1671_v15, %v1796_v61 }
 0x295   :  { %v2213_v39 = vmax.f32 %v3163_v8, %v3182_v31 }
 0x296   :  { %v1264_v13 = vpop.f32.mrf.mxu2  ;;  %v1564_v44 = vsel %vm1501_vm9, %v1561_v57, %v1563_v35  ;;  %v2030_v17 = vrot.slane %v1907_v4, 4 }
 0x297   :  { %v1265_v36 = vadd.f32 %v3096_v7, %v1264_v13  ;;  %v1673_v32 = vmax.f32 %v1436_v34, %v1564_v44 }
 0x298   :  { %v2031_v23 = vsel %vm1974_vm6, %v2028_v20, %v2030_v17 }
 0x299   :  { %vm1342_vm13 = vcmp.gt.f32.partialorder %v1265_v36, 0.0  ;;  %v1390_v37 = vmul.f32 0.01, %v1265_v36  ;;  %v1797_v48 = vrot.slane %v1673_v32, 2  ;;  %v2143_v44 = vmax.f32 %v3170_v41, %v2031_v23 }
 0x29b   :  { %v1438_v27 = vsel %vm1342_vm13, %v1265_v36, %v1390_v37  ;;  %v1798_v50 = vsel %vm224_vm0, %v1795_v25, %v1797_v48 }
 0x29c   :  { %v1565_v40 = vrot.slane %v1438_v27, 1  ;;  %v1908_v3 = vmax.f32 %v1672_v42, %v1798_v50 }
 0x29e   :  { %v1566_v43 = vsel %vm1501_vm9, %v1563_v35, %v1565_v40  ;;  %v1267_v45 = vpop.f32.mrf.mxu2  ;;  %v2032_v11 = vrot.slane %v1908_v3, 4 }
 0x29f   :  { %v1674_v46 = vmax.f32 %v1437_v30, %v1566_v43  ;;  %v1268_v47 = vadd.f32 %v3096_v7, %v1267_v45 }
 0x2a0   :  { %v2033_v15 = vsel %vm1974_vm6, %v2030_v17, %v2032_v11 }
 0x2a1   :  { %v1799_v51 = vrot.slane %v1674_v46, 2  ;;  %vm1343_vm14 = vcmp.gt.f32.partialorder %v1268_v47, 0.0  ;;  %v1391_v52 = vmul.f32 0.01, %v1268_v47  ;;  %v2144_v57 = vmax.f32 %v1907_v4, %v2033_v15 }
 0x2a3   :  { %v1800_v53 = vsel %vm224_vm0, %v1797_v48, %v1799_v51  ;;  %v1439_v54 = vsel %vm1343_vm14, %v1268_v47, %v1391_v52  ;;  %v2185_v48 = vmax.f32 %v3179_v29, %v2143_v44 }
 0x2a4   :  { %v1567_v59 = vrot.slane %v1439_v54, 1  ;;  %v1270_v56 = vpop.f32.mrf.mxu3  ;;  %v1909_v62 = vmax.f32 %v1673_v32, %v1800_v53 }
 0x2a5   :  { %v1271_v60 = vadd.f32 %v3096_v7, %v1270_v56 }
 0x2a6   :  { %v1568_v63 = vsel %vm1501_vm9, %v1565_v40, %v1567_v59  ;;  %v2034_v1 = vrot.slane %v1909_v62, 4 }
 0x2a7   :  { %v1675_v0 = vmax.f32 %v1438_v27, %v1568_v63  ;;  %vm1344_vm15 = vcmp.gt.f32.partialorder %v1271_v60, 0.0  ;;  %v1392_v2 = vmul.f32 0.01, %v1271_v60 }
 0x2a8   :  { %v2035_v19 = vsel %vm1974_vm6, %v2032_v11, %v2034_v1 }
 0x2a9   :  { %v1801_v5 = vrot.slane %v1675_v0, 2  ;;  %v1440_v6 = vsel %vm1344_vm15, %v1271_v60, %v1392_v2  ;;  %v2145_v26 = vmax.f32 %v1908_v3, %v2035_v19 }
 0x2aa   :  { %v1569_v9 = vrot.slane %v1440_v6, 1 }
 0x2ab   :  { %v1802_v10 = vsel %vm224_vm0, %v1799_v51, %v1801_v5  ;;  %v2187_v27 = vmax.f32 %v2144_v57, %v2145_v26  ;;  %v2186_v51 = vmax.f32 %v2143_v44, %v2144_v57 }
 0x2ac   :  { %v1910_v49 = vmax.f32 %v1674_v46, %v1802_v10  ;;  %v1570_v55 = vsel %vm1501_vm9, %v1567_v59, %v1569_v9  ;;  %v1677_v58 = vmax.f32 %v1440_v6, %v1569_v9 }
 0x2ad   :  { %v1676_v12 = vmax.f32 %v1439_v54, %v1570_v55  ;;  %v2214_v59 = vmax.f32 %v2185_v48, %v2187_v27 }
 0x2ae   :  { %v2036_v16 = vrot.slane %v1910_v49, 4  ;;  %v1805_v18 = vrot.slane %v1677_v58, 2 }
 0x2af   :  { %v1803_v33 = vrot.slane %v1676_v12, 2 }
 0x2b0   :  { %v1913_v38 = vmax.f32 %v1677_v58, %v1805_v18  ;;  %v2037_v22 = vsel %vm1974_vm6, %v2034_v1, %v2036_v16 }
 0x2b1   :  { %v1804_v14 = vsel %vm224_vm0, %v1801_v5, %v1803_v33  ;;  %v1806_v24 = vsel %vm224_vm0, %v1803_v33, %v1805_v18  ;;  %v2146_v34 = vmax.f32 %v1909_v62, %v2037_v22 }
 0x2b2   :  { %v1911_v28 = vmax.f32 %v1675_v0, %v1804_v14  ;;  %v1912_v30 = vmax.f32 %v1676_v12, %v1806_v24  ;;  %v1273_v35 = vpop.f32.mrf.mxu3  ;;  %v2042_v13 = vrot.slane %v1913_v38, 4 }
 0x2b3   :  { %v1274_v21 = vadd.f32 %v3096_v7, %v1273_v35  ;;  %v2188_v42 = vmax.f32 %v2145_v26, %v2146_v34 }
 0x2b4   :  { %v2038_v36 = vrot.slane %v1911_v28, 4  ;;  %v2040_v37 = vrot.slane %v1912_v30, 4  ;;  %v2150_v47 = vmax.f32 %v1913_v38, %v2042_v13 }
 0x2b5   :  { %vm1345_vm3 = vcmp.gt.f32.partialorder %v1274_v21, 0.0  ;;  %v1393_v52 = vmul.f32 0.01, %v1274_v21  ;;  %v2215_v50 = vmax.f32 %v2186_v51, %v2188_v42 }
 0x2b6   :  { %v2039_v40 = vsel %vm1974_vm6, %v2036_v16, %v2038_v36  ;;  %v2041_v32 = vsel %vm1974_vm6, %v2038_v36, %v2040_v37  ;;  %v2043_v20 = vsel %vm1974_vm6, %v2040_v37, %v2042_v13 }
 0x2b7   :  { %v2147_v43 = vmax.f32 %v1910_v49, %v2039_v40  ;;  %v2148_v45 = vmax.f32 %v1911_v28, %v2041_v32  ;;  %v2149_v46 = vmax.f32 %v1912_v30, %v2043_v20  ;;  %v1441_v63 = vsel %vm1345_vm3, %v1274_v21, %v1393_v52 }
 0x2b8   :  { %v2229_v6 = vmax.f32 %v2213_v39, %v2215_v50  ;;  %v1571_v1 = vrot.slane %v1441_v63, 1 }
 0x2b9   :  { %v2189_v41 = vmax.f32 %v2146_v34, %v2147_v43  ;;  %v2190_v25 = vmax.f32 %v2147_v43, %v2148_v45  ;;  %v2191_v53 = vmax.f32 %v2148_v45, %v2149_v46  ;;  %v2192_v54 = vmax.f32 %v2149_v46, %v2150_v47 }
 0x2ba   :  { %v1276_v56 = vpop.f32.mrf.mxu3 }
 0x2bb   :  { %v2216_v60 = vmax.f32 %v2189_v41, %v2191_v53  ;;  %v2217_v61 = vmax.f32 %v2190_v25, %v2192_v54  ;;  %v1277_v62 = vadd.f32 %v3096_v7, %v1276_v56 }
 0x2bd   :  { %v2230_v0 = vmax.f32 %v2214_v59, %v2216_v60  ;;  %v2231_v2 = vmax.f32 %v2215_v50, %v2217_v61  ;;  %vm1346_vm2 = vcmp.gt.f32.partialorder %v1277_v62, 0.0  ;;  %v1394_v3 = vmul.f32 0.01, %v1277_v62 }
 0x2bf   :  { %v2249_v29 = vrot.slane %v2230_v0, 2  ;;  %v2250_v4 = vrot.slane %v2231_v2, 2  ;;  %v1442_v5 = vsel %vm1346_vm2, %v1277_v62, %v1394_v3 }
 0x2c0   :  { %v1572_v9 = vrot.slane %v1442_v5, 1 }
 0x2c1   :  { %v2251_v10 = vsel %vm224_vm0, %v2249_v29, %v2250_v4 }
 0x2c2   :  { %v2261_v11 = vmax.f32 %v2229_v6, %v2251_v10  ;;  %v1573_v49 = vsel %vm1501_vm9, %v1571_v1, %v1572_v9  ;;  %v1279_v55 = vpop.f32.mrf.mxu3 }
 0x2c3   :  { %v1678_v58 = vmax.f32 %v1441_v63, %v1573_v49  ;;  %v1280_v17 = vadd.f32 %v3096_v7, %v1279_v55 }
 0x2c4   :  { %2265 = vst [vmem:[%s3295_s7 + $0x10] sm:$0x7f] %v2261_v11 }
 0x2c5   :  { %vm1347_vm4 = vcmp.gt.f32.partialorder %v1280_v17, 0.0  ;;  %v1395_v12 = vmul.f32 0.01, %v1280_v17  ;;  %v1807_v33 = vrot.slane %v1678_v58, 2 }
 0x2c7   :  { %v1443_v16 = vsel %vm1347_vm4, %v1280_v17, %v1395_v12 }
 0x2c8   :  { %v1574_v8 = vrot.slane %v1443_v16, 1 }
 0x2ca   :  { %v1575_v31 = vsel %vm1501_vm9, %v1572_v9, %v1574_v8  ;;  %v1282_v39 = vpop.f32.mrf.mxu3 }
 0x2cb   :  { %v1679_v18 = vmax.f32 %v1442_v5, %v1575_v31  ;;  %v1283_v19 = vadd.f32 %v3096_v7, %v1282_v39 }
 0x2cd   :  { %v1808_v38 = vrot.slane %v1679_v18, 2  ;;  %vm1348_vm1 = vcmp.gt.f32.partialorder %v1283_v19, 0.0  ;;  %v1396_v15 = vmul.f32 0.01, %v1283_v19 }
 0x2cf   :  { %v1809_v22 = vsel %vm224_vm0, %v1807_v33, %v1808_v38  ;;  %v1444_v14 = vsel %vm1348_vm1, %v1283_v19, %v1396_v15 }
 0x2d0   :  { %v1914_v24 = vmax.f32 %v1678_v58, %v1809_v22  ;;  %v1576_v23 = vrot.slane %v1444_v14, 1 }
 0x2d2   :  { %v1577_v26 = vsel %vm1501_vm9, %v1574_v8, %v1576_v23  ;;  %v2044_v44 = vrot.slane %v1914_v24, 4 }
 0x2d3   :  { %v1680_v28 = vmax.f32 %v1443_v16, %v1577_v26  ;;  %v1285_v30 = vpop.f32.mrf.mxu3 }
 0x2d4   :  { %v1286_v35 = vadd.f32 %v3096_v7, %v1285_v30 }
 0x2d5   :  { %v1810_v34 = vrot.slane %v1680_v28, 2 }
 0x2d6   :  { %vm1349_vm5 = vcmp.gt.f32.partialorder %v1286_v35, 0.0  ;;  %v1397_v57 = vmul.f32 0.01, %v1286_v35 }
 0x2d7   :  { %v1811_v13 = vsel %vm224_vm0, %v1808_v38, %v1810_v34 }
 0x2d8   :  { %v1915_v36 = vmax.f32 %v1679_v18, %v1811_v13  ;;  %v1445_v37 = vsel %vm1349_vm5, %v1286_v35, %v1397_v57 }
 0x2d9   :  { %v1578_v27 = vrot.slane %v1445_v37, 1 }
 0x2da   :  { %v2045_v21 = vrot.slane %v1915_v36, 4 }
 0x2db   :  { %v1579_v32 = vsel %vm1501_vm9, %v1576_v23, %v1578_v27  ;;  %v1288_v20 = vpop.f32.mrf.mxu3 }
 0x2dc   :  { %v2046_v40 = vsel %vm1974_vm6, %v2044_v44, %v2045_v21  ;;  %v1681_v42 = vmax.f32 %v1444_v14, %v1579_v32  ;;  %v1289_v43 = vadd.f32 %v3096_v7, %v1288_v20 }
 0x2dd   :  { %v2151_v45 = vmax.f32 %v1914_v24, %v2046_v40 }
 0x2de   :  { %v1812_v46 = vrot.slane %v1681_v42, 2  ;;  %vm1350_vm7 = vcmp.gt.f32.partialorder %v1289_v43, 0.0  ;;  %v1398_v47 = vmul.f32 0.01, %v1289_v43 }
 0x2e0   :  { %v1813_v48 = vsel %vm224_vm0, %v1810_v34, %v1812_v46  ;;  %v1446_v51 = vsel %vm1350_vm7, %v1289_v43, %v1398_v47 }
 0x2e1   :  { %v1916_v52 = vmax.f32 %v1680_v28, %v1813_v48  ;;  %v1580_v41 = vrot.slane %v1446_v51, 1 }
 0x2e3   :  { %v2047_v25 = vrot.slane %v1916_v52, 4  ;;  %v1581_v53 = vsel %vm1501_vm9, %v1578_v27, %v1580_v41  ;;  %v1291_v54 = vpop.f32.mrf.mxu3 }
 0x2e4   :  { %v1682_v59 = vmax.f32 %v1445_v37, %v1581_v53  ;;  %v1292_v56 = vadd.f32 %v3096_v7, %v1291_v54 }
 0x2e5   :  { %v2048_v50 = vsel %vm1974_vm6, %v2045_v21, %v2047_v25 }
 0x2e6   :  { %v1814_v60 = vrot.slane %v1682_v59, 2  ;;  %vm1351_vm10 = vcmp.gt.f32.partialorder %v1292_v56, 0.0  ;;  %v1399_v61 = vmul.f32 0.01, %v1292_v56  ;;  %v2152_v62 = vmax.f32 %v1915_v36, %v2048_v50 }
 0x2e8   :  { %v1815_v63 = vsel %vm224_vm0, %v1812_v46, %v1814_v60  ;;  %v1447_v0 = vsel %vm1351_vm10, %v1292_v56, %v1399_v61  ;;  %v3236_v2 = vmax.f32 %v2151_v45, %v2152_v62 }
 0x2e9   :  { %v1917_v3 = vmax.f32 %v1681_v42, %v1815_v63  ;;  %v1582_v29 = vrot.slane %v1447_v0, 1 }
 0x2eb   :  { %v2049_v4 = vrot.slane %v1917_v3, 4  ;;  %v1583_v5 = vsel %vm1501_vm9, %v1580_v41, %v1582_v29  ;;  %v1294_v6 = vpop.f32.mrf.mxu3 }
 0x2ec   :  { %v1683_v1 = vmax.f32 %v1446_v51, %v1583_v5  ;;  %v1295_v17 = vadd.f32 %v3096_v7, %v1294_v6 }
 0x2ed   :  { %v2050_v9 = vsel %vm1974_vm6, %v2047_v25, %v2049_v4 }
 0x2ee   :  { %v1816_v10 = vrot.slane %v1683_v1, 2  ;;  %v2153_v11 = vmax.f32 %v1916_v52, %v2050_v9  ;;  %v1400_v18 = vmul.f32 0.01, %v1295_v17  ;;  %vm1352_vm8 = vcmp.gt.f32.partialorder %v1295_v17, 0.0 }
 0x2f0   :  { %v1817_v49 = vsel %vm224_vm0, %v1814_v60, %v1816_v10  ;;  %v1448_v15 = vsel %vm1352_vm8, %v1295_v17, %v1400_v18 }
 0x2f1   :  { %v3241_v55 = vmax.f32 %v1682_v59, %v1817_v49  ;;  %v1584_v23 = vrot.slane %v1448_v15, 1 }
 0x2f3   :  { %v2051_v58 = vrot.slane %v3241_v55, 4  ;;  %v1297_v12 = vpop.f32.mrf.mxu3  ;;  %v1585_v35 = vsel %vm1501_vm9, %v1582_v29, %v1584_v23 }
 0x2f4   :  { %v1298_v16 = vadd.f32 %v3096_v7, %v1297_v12  ;;  %v1684_v21 = vmax.f32 %v1447_v0, %v1585_v35 }
 0x2f5   :  { %v2052_v8 = vsel %vm1974_vm6, %v2049_v4, %v2051_v58 }
 0x2f6   :  { %v1401_v31 = vmul.f32 0.01, %v1298_v16  ;;  %v3249_v39 = vmax.f32 %v1917_v3, %v2052_v8  ;;  %vm1353_vm11 = vcmp.gt.f32.partialorder %v1298_v16, 0.0  ;;  %v1818_v42 = vrot.slane %v1684_v21, 2 }
 0x2f8   :  { %v3252_v19 = vmax.f32 %v2153_v11, %v3249_v39  ;;  %v1449_v33 = vsel %vm1353_vm11, %v1298_v16, %v1401_v31  ;;  %v1819_v41 = vsel %vm224_vm0, %v1816_v10, %v1818_v42 }
 0x2f9   :  { %v1586_v24 = vrot.slane %v1449_v33, 1  ;;  %v1919_v56 = vmax.f32 %v1683_v1, %v1819_v41 }
 0x2fa   :  { %v2218_v38 = vmax.f32 %v3236_v2, %v3252_v19 }
 0x2fb   :  { %v1300_v22 = vpop.f32.mrf.mxu3  ;;  %v1587_v30 = vsel %vm1501_vm9, %v1584_v23, %v1586_v24 }
 0x2fc   :  { %v1301_v14 = vadd.f32 %v3096_v7, %v1300_v22  ;;  %v1685_v36 = vmax.f32 %v1448_v15, %v1587_v30 }
 0x2fe   :  { %vm1354_vm12 = vcmp.gt.f32.partialorder %v1301_v14, 0.0  ;;  %v1402_v26 = vmul.f32 0.01, %v1301_v14  ;;  %v1820_v32 = vrot.slane %v1685_v36, 2 }
 0x300   :  { %v1450_v28 = vsel %vm1354_vm12, %v1301_v14, %v1402_v26  ;;  %v1821_v48 = vsel %vm224_vm0, %v1818_v42, %v1820_v32 }
 0x301   :  { %v1588_v34 = vrot.slane %v1450_v28, 1  ;;  %v1920_v59 = vmax.f32 %v1684_v21, %v1821_v48 }
 0x303   :  { %v1589_v13 = vsel %vm1501_vm9, %v1586_v24, %v1588_v34  ;;  %v1303_v57 = vpop.f32.mrf.mxu3  ;;  %v2055_v0 = vrot.slane %v1920_v59, 4 }
 0x304   :  { %v1686_v37 = vmax.f32 %v1449_v33, %v1589_v13  ;;  %v1304_v44 = vadd.f32 %v3096_v7, %v1303_v57 }
 0x306   :  { %v1822_v27 = vrot.slane %v1686_v37, 2  ;;  %vm1355_vm13 = vcmp.gt.f32.partialorder %v1304_v44, 0.0  ;;  %v1403_v40 = vmul.f32 0.01, %v1304_v44 }
 0x308   :  { %v1451_v20 = vsel %vm1355_vm13, %v1304_v44, %v1403_v40  ;;  %v1823_v45 = vsel %vm224_vm0, %v1820_v32, %v1822_v27 }
 0x309   :  { %v1590_v43 = vrot.slane %v1451_v20, 1  ;;  %v1921_v25 = vmax.f32 %v1685_v36, %v1823_v45 }
 0x30b   :  { %v1591_v46 = vsel %vm1501_vm9, %v1588_v34, %v1590_v43  ;;  %v1306_v47 = vpop.f32.mrf.mxu3  ;;  %v2057_v61 = vrot.slane %v1921_v25, 4 }
 0x30c   :  { %v1687_v51 = vmax.f32 %v1450_v28, %v1591_v46  ;;  %v1307_v52 = vadd.f32 %v3096_v7, %v1306_v47  ;;  %v2053_v7 = vrot.slane %v1919_v56, 4 }
 0x30d   :  { %v2058_v9 = vsel %vm1974_vm6, %v2055_v0, %v2057_v61 }
 0x30e   :  { %v1824_v53 = vrot.slane %v1687_v51, 2  ;;  %vm1356_vm14 = vcmp.gt.f32.partialorder %v1307_v52, 0.0  ;;  %v1404_v54 = vmul.f32 0.01, %v1307_v52  ;;  %v2056_v49 = vsel %vm1974_vm6, %v2053_v7, %v2055_v0 }
 0x30f   :  { %v2054_v16 = vsel %vm1974_vm6, %v2051_v58, %v2053_v7  ;;  %v2157_v8 = vmax.f32 %v1920_v59, %v2058_v9  ;;  %v2156_v22 = vmax.f32 %v1919_v56, %v2056_v49 }
 0x310   :  { %v1825_v50 = vsel %vm224_vm0, %v1822_v27, %v1824_v53  ;;  %v1452_v60 = vsel %vm1356_vm14, %v1307_v52, %v1404_v54  ;;  %v2155_v23 = vmax.f32 %v3241_v55, %v2054_v16 }
 0x311   :  { %v1922_v62 = vmax.f32 %v1686_v37, %v1825_v50  ;;  %v1592_v63 = vrot.slane %v1452_v60, 1  ;;  %v2197_v26 = vmax.f32 %v2156_v22, %v2157_v8 }
 0x312   :  { %v2195_v37 = vmax.f32 %v3249_v39, %v2155_v23  ;;  %v2196_v44 = vmax.f32 %v2155_v23, %v2156_v22 }
 0x313   :  { %v2059_v3 = vrot.slane %v1922_v62, 4  ;;  %v1593_v29 = vsel %vm1501_vm9, %v1590_v43, %v1592_v63  ;;  %v1689_v4 = vmax.f32 %v1452_v60, %v1592_v63 }
 0x314   :  { %v1688_v5 = vmax.f32 %v1451_v20, %v1593_v29  ;;  %v2219_v55 = vmax.f32 %v2195_v37, %v2197_v26 }
 0x315   :  { %v1828_v6 = vrot.slane %v1689_v4, 2  ;;  %v2060_v11 = vsel %vm1974_vm6, %v2057_v61, %v2059_v3 }
 0x316   :  { %v1826_v10 = vrot.slane %v1688_v5, 2  ;;  %v2158_v33 = vmax.f32 %v1921_v25, %v2060_v11 }
 0x317   :  { %v1925_v1 = vmax.f32 %v1689_v4, %v1828_v6 }
 0x318   :  { %v1827_v17 = vsel %vm224_vm0, %v1824_v53, %v1826_v10  ;;  %v1829_v12 = vsel %vm224_vm0, %v1826_v10, %v1828_v6  ;;  %v2198_v35 = vmax.f32 %v2157_v8, %v2158_v33 }
 0x319   :  { %v1923_v31 = vmax.f32 %v1687_v51, %v1827_v17  ;;  %v1924_v18 = vmax.f32 %v1688_v5, %v1829_v12  ;;  %v2065_v15 = vrot.slane %v1925_v1, 4 }
 0x31a   :  { %v2220_v20 = vmax.f32 %v2196_v44, %v2198_v35 }
 0x31b   :  { %v2061_v14 = vrot.slane %v1923_v31, 4  ;;  %v2063_v24 = vrot.slane %v1924_v18, 4  ;;  %v2162_v36 = vmax.f32 %v1925_v1, %v2065_v15 }
 0x31c   :  { %v2232_v51 = vmax.f32 %v2218_v38, %v2220_v20 }
 0x31d   :  { %v2062_v28 = vsel %vm1974_vm6, %v2059_v3, %v2061_v14  ;;  %v2064_v30 = vsel %vm1974_vm6, %v2061_v14, %v2063_v24  ;;  %v2066_v34 = vsel %vm1974_vm6, %v2063_v24, %v2065_v15 }
 0x31e   :  { %v2159_v13 = vmax.f32 %v1922_v62, %v2062_v28  ;;  %v2160_v58 = vmax.f32 %v1923_v31, %v2064_v30  ;;  %v2161_v57 = vmax.f32 %v1924_v18, %v2066_v34 }
 0x320   :  { %v2199_v21 = vmax.f32 %v2158_v33, %v2159_v13  ;;  %v2200_v27 = vmax.f32 %v2159_v13, %v2160_v58  ;;  %v2201_v40 = vmax.f32 %v2160_v58, %v2161_v57  ;;  %v2202_v32 = vmax.f32 %v2161_v57, %v2162_v36 }
 0x322   :  { %v2221_v42 = vmax.f32 %v2199_v21, %v2201_v40  ;;  %v2222_v43 = vmax.f32 %v2200_v27, %v2202_v32 }
 0x324   :  { %v2233_v45 = vmax.f32 %v2219_v55, %v2221_v42  ;;  %v2234_v46 = vmax.f32 %v2220_v20, %v2222_v43 }
 0x326   :  { %v2252_v47 = vrot.slane %v2233_v45, 2  ;;  %v2253_v48 = vrot.slane %v2234_v46, 2 }
 0x328   :  { %v2254_v52 = vsel %vm224_vm0, %v2252_v47, %v2253_v48 }
 0x329   :  { %v2262_v39 = vmax.f32 %v2232_v51, %v2254_v52 }
 0x32b   :  { %2266 = vst [vmem:[%s3295_s7 + $0x18] sm:$0x7f] %v2262_v39 }

</bundles_post_ra>
